<compile_context>
chip_gen: v7x
topology: tpu7x:2x2x1
jax: 0.10.0
libtpu: 0.0.40
codegen_flags: <defaults>
</compile_context>

<pallas_src>
import math
from functools import partial

import jax
import jax.numpy as jnp
from jax.experimental import pallas as pl
from jax.experimental.pallas import tpu as pltpu

LN_EPS = 1e-5  # PyTorch nn.LayerNorm default


def _gelu(x):
    # TODO(synk): PyTorch nn.GELU() default is exact erf-based GELU; tanh approx
    # is used since exact-erf lowering is not guaranteed in Mosaic (~1e-3 rel diff).
    return jax.nn.gelu(x, approximate=True)


def _layernorm(x, gamma, beta):
    mu = jnp.mean(x, axis=-1, keepdims=True)
    var = jnp.mean(jnp.square(x - mu), axis=-1, keepdims=True)
    return (x - mu) * jax.lax.rsqrt(var + LN_EPS) * gamma + beta


def _projector(x, w1, b1, g1, be1, w2, b2):
    """Linear -> LayerNorm -> GELU -> (Dropout=id) -> Linear."""
    h = jnp.dot(x, w1, preferred_element_type=jnp.float32) + b1
    h = _layernorm(h, g1, be1)
    h = _gelu(h)
    return jnp.dot(h, w2, preferred_element_type=jnp.float32) + b2


def _mha(x_q, x_kv, wq, wk, wv, wo, bq, bk, bv, bo, num_heads):
    """nn.MultiheadAttention on 2-D (unbatched) inputs: batch axis == sequence."""
    L = wq.shape[1]
    dh = L // num_heads
    scale = 1.0 / math.sqrt(dh)
    q = (jnp.dot(x_q, wq, preferred_element_type=jnp.float32) + bq) * scale  # scale once
    k = jnp.dot(x_kv, wk, preferred_element_type=jnp.float32) + bk
    v = jnp.dot(x_kv, wv, preferred_element_type=jnp.float32) + bv
    attn_out = None
    for h in range(num_heads):
        sl = slice(h * dh, (h + 1) * dh)
        qh, kh, vh = q[:, sl], k[:, sl], v[:, sl]
        # qh @ kh.T (contract last dims, no explicit transpose)
        s = jax.lax.dot_general(qh, kh, (((1,), (1,)), ((), ())),
                                preferred_element_type=jnp.float32)
        s = s - jnp.max(s, axis=-1, keepdims=True)
        p = jnp.exp(s)
        p = p * pl.reciprocal(jnp.sum(p, axis=-1, keepdims=True), approx=True)
        head = jnp.dot(p, vh, preferred_element_type=jnp.float32)          # (B, dh)
        # Fold the per-head output straight into the output projection slice:
        contrib = jnp.dot(head, wo[sl, :], preferred_element_type=jnp.float32)  # (B, L)
        attn_out = contrib if attn_out is None else attn_out + contrib
    return attn_out + bo


def _fusion(a, b, wa, wb, bias, gamma, beta):
    """concat -> Linear(2L->L) -> LayerNorm -> (Dropout=id), as split-weight matmuls."""
    h = (jnp.dot(a, wa, preferred_element_type=jnp.float32)
         + jnp.dot(b, wb, preferred_element_type=jnp.float32) + bias)
    h = _layernorm(h, gamma, beta)
    nrm = jnp.sqrt(jnp.sum(h * h, axis=-1, keepdims=True))
    hn = h * pl.reciprocal(jnp.maximum(nrm, 1e-12), approx=True)  # F.normalize(p=2, dim=1)
    return h, hn


# ----------------------------- the single fused kernel -----------------------------

def fused_aligner_kernel(
        graph_ref, text_ref,
        gp_w1, gp_b1, gp_g1, gp_be1, gp_w2, gp_b2,
        tp_w1, tp_b1, tp_g1, tp_be1, tp_w2, tp_b2,
        g2t_wq, g2t_wk, g2t_wv, g2t_wo, g2t_bq, g2t_bk, g2t_bv, g2t_bo,
        t2g_wq, t2g_wk, t2g_wv, t2g_wo, t2g_bq, t2g_bk, t2g_bv, t2g_bo,
        gf_wa, gf_wb, gf_b, gf_g, gf_be,
        tf_wa, tf_wb, tf_b, tf_g, tf_be,
        pg_w, pg_b, pt_w, pt_b, pf_wa, pf_wb, pf_b,
        out_ref, *, num_heads, L, C):
    graph_latent = _projector(graph_ref[...], gp_w1[...], gp_b1[...], gp_g1[...],
                              gp_be1[...], gp_w2[...], gp_b2[...])
    text_latent = _projector(text_ref[...], tp_w1[...], tp_b1[...], tp_g1[...],
                             tp_be1[...], tp_w2[...], tp_b2[...])

    graph_attended = _mha(graph_latent, text_latent,
                          g2t_wq[...], g2t_wk[...], g2t_wv[...], g2t_wo[...],
                          g2t_bq[...], g2t_bk[...], g2t_bv[...], g2t_bo[...], num_heads)
    text_attended = _mha(text_latent, graph_latent,
                         t2g_wq[...], t2g_wk[...], t2g_wv[...], t2g_wo[...],
                         t2g_bq[...], t2g_bk[...], t2g_bv[...], t2g_bo[...], num_heads)

    graph_fused, graph_norm = _fusion(graph_latent, graph_attended,
                                      gf_wa[...], gf_wb[...], gf_b[...], gf_g[...], gf_be[...])
    text_fused, text_norm = _fusion(text_latent, text_attended,
                                    tf_wa[...], tf_wb[...], tf_b[...], tf_g[...], tf_be[...])

    graph_preds = jnp.dot(graph_fused, pg_w[...], preferred_element_type=jnp.float32) + pg_b[...]
    text_preds = jnp.dot(text_fused, pt_w[...], preferred_element_type=jnp.float32) + pt_b[...]
    # fusion_predictor on cat([graph_fused, text_fused]) via split weights (no concat)
    fusion_preds = (jnp.dot(graph_fused, pf_wa[...], preferred_element_type=jnp.float32)
                    + jnp.dot(text_fused, pf_wb[...], preferred_element_type=jnp.float32)
                    + pf_b[...])

    # Packed lane-dense output slab; [0:2L] doubles as joint_latent (no concat needed).
    out_ref[...] = jnp.zeros_like(out_ref)          # clear pad lanes
    out_ref[:, 0:L] = graph_fused
    out_ref[:, L:2 * L] = text_fused
    out_ref[:, 2 * L:3 * L] = graph_norm
    out_ref[:, 3 * L:4 * L] = text_norm
    out_ref[:, 4 * L:4 * L + C] = graph_preds
    out_ref[:, 4 * L + C:4 * L + 2 * C] = text_preds
    out_ref[:, 4 * L + 2 * C:4 * L + 3 * C] = fusion_preds


# ----------------------------- parameters -----------------------------

def init_params(key, graph_dim, text_dim, latent_dim, num_classes):
    keys = iter(jax.random.split(key, 64))

    def lin(in_d, out_d):
        w = jax.random.normal(next(keys), (in_d, out_d), jnp.float32) * (1.0 / math.sqrt(in_d))
        b = jax.random.normal(next(keys), (1, out_d), jnp.float32) * 0.01
        return w, b

    L = latent_dim
    p = {}
    # projectors: Linear(d, 2L) -> LN(2L) -> GELU -> Drop -> Linear(2L, L)
    for pre, d in (("gp", graph_dim), ("tp", text_dim)):
        p[pre + "_w1"], p[pre + "_b1"] = lin(d, 2 * L)
        p[pre + "_g1"] = jnp.ones((1, 2 * L), jnp.float32)
        p[pre + "_be1"] = jnp.zeros((1, 2 * L), jnp.float32)
        p[pre + "_w2"], p[pre + "_b2"] = lin(2 * L, L)
    # cross-modal attention blocks (q/k/v/out projections, each L x L)
    for pre in ("g2t", "t2g"):
        for m in ("q", "k", "v", "o"):
            p[f"{pre}_w{m}"], p[f"{pre}_b{m}"] = lin(L, L)
    # fusion blocks: Linear(2L, L) -> LN(L) -> Drop  (weight kept in concat layout)
    for pre in ("gf", "tf"):
        p[pre + "_w"], p[pre + "_b"] = lin(2 * L, L)
        p[pre + "_g"] = jnp.ones((1, L), jnp.float32)
        p[pre + "_be"] = jnp.zeros((1, L), jnp.float32)
    # predictors
    p["pg_w"], p["pg_b"] = lin(L, num_classes)
    p["pt_w"], p["pt_b"] = lin(L, num_classes)
    p["pf_w"], p["pf_b"] = lin(2 * L, num_classes)
    return p


# ----------------------------- forward pass -----------------------------

def enhanced_multimodal_aligner_forward(params, graph_embeds, text_embeds, *, num_heads=4):
    B = graph_embeds.shape[0]
    L = params["gp_w2"].shape[1]
    C = params["pg_w"].shape[1]
    used = 4 * L + 3 * C
    out_w = ((used + 127) // 128) * 128   # lane-dense packed output width

    # Split-weight forms of the concat-based Linears: cat([a,b]) @ W == a@W[:L] + b@W[L:].
    flat_inputs = [
        graph_embeds, text_embeds,
        params["gp_w1"], params["gp_b1"], params["gp_g1"], params["gp_be1"],
        params["gp_w2"], params["gp_b2"],
        params["tp_w1"], params["tp_b1"], params["tp_g1"], params["tp_be1"],
        params["tp_w2"], params["tp_b2"],
        params["g2t_wq"], params["g2t_wk"], params["g2t_wv"], params["g2t_wo"],
        params["g2t_bq"], params["g2t_bk"], params["g2t_bv"], params["g2t_bo"],
        params["t2g_wq"], params["t2g_wk"], params["t2g_wv"], params["t2g_wo"],
        params["t2g_bq"], params["t2g_bk"], params["t2g_bv"], params["t2g_bo"],
        params["gf_w"][:L], params["gf_w"][L:], params["gf_b"], params["gf_g"], params["gf_be"],
        params["tf_w"][:L], params["tf_w"][L:], params["tf_b"], params["tf_g"], params["tf_be"],
        params["pg_w"], params["pg_b"], params["pt_w"], params["pt_b"],
        params["pf_w"][:L], params["pf_w"][L:], params["pf_b"],
    ]

    vmem = pl.BlockSpec(memory_space=pltpu.MemorySpace.VMEM)
    packed = pl.pallas_call(
        partial(fused_aligner_kernel, num_heads=num_heads, L=L, C=C),
        out_shape=jax.ShapeDtypeStruct((B, out_w), jnp.float32),
        in_specs=[vmem] * len(flat_inputs),
        out_specs=vmem,
    )(*flat_inputs)

    graph_fused = packed[:, 0:L]
    text_fused = packed[:, L:2 * L]
    return {
        "graph_latent": graph_fused,
        "text_latent": text_fused,
        "graph_latent_norm": packed[:, 2 * L:3 * L],
        "text_latent_norm": packed[:, 3 * L:4 * L],
        "joint_latent": packed[:, 0:2 * L],
        "graph_preds": packed[:, 4 * L:4 * L + C],
        "text_preds": packed[:, 4 * L + C:4 * L + 2 * C],
        "fusion_preds": packed[:, 4 * L + 2 * C:4 * L + 3 * C],
    }


# ----------------------------- main -----------------------------

if __name__ == "__main__":
    B, GRAPH_DIM, TEXT_DIM, LATENT_DIM, NUM_CLASSES, NUM_HEADS = 8, 48, 64, 32, 6, 4

    key = jax.random.PRNGKey(0)
    k_params, k_g, k_t = jax.random.split(key, 3)
    params = init_params(k_params, GRAPH_DIM, TEXT_DIM, LATENT_DIM, NUM_CLASSES)
    graph_embeds = jax.random.normal(k_g, (B, GRAPH_DIM), jnp.float32)
    text_embeds = jax.random.normal(k_t, (B, TEXT_DIM), jnp.float32)

    fwd = jax.jit(partial(enhanced_multimodal_aligner_forward, num_heads=NUM_HEADS))
    outputs = fwd(params, graph_embeds, text_embeds)
    jax.block_until_ready(outputs)

    assert outputs["graph_latent"].shape == (B, LATENT_DIM)
    assert outputs["text_latent"].shape == (B, LATENT_DIM)
    assert outputs["graph_latent_norm"].shape == (B, LATENT_DIM)
    assert outputs["text_latent_norm"].shape == (B, LATENT_DIM)
    assert outputs["joint_latent"].shape == (B, 2 * LATENT_DIM)
    assert outputs["graph_preds"].shape == (B, NUM_CLASSES)
    assert outputs["text_preds"].shape == (B, NUM_CLASSES)
    assert outputs["fusion_preds"].shape == (B, NUM_CLASSES)

    print("KERNEL_OK")
</pallas_src>

<mosaic_0001>
module attributes {stable_mosaic.version = 11 : i64} {
  func.func @fused_aligner_kernel(%arg0: memref<8x48xf32, #tpu.memory_space<vmem>>, %arg1: memref<8x64xf32, #tpu.memory_space<vmem>>, %arg2: memref<48x64xf32, #tpu.memory_space<vmem>>, %arg3: memref<1x64xf32, #tpu.memory_space<vmem>>, %arg4: memref<1x64xf32, #tpu.memory_space<vmem>>, %arg5: memref<1x64xf32, #tpu.memory_space<vmem>>, %arg6: memref<64x32xf32, #tpu.memory_space<vmem>>, %arg7: memref<1x32xf32, #tpu.memory_space<vmem>>, %arg8: memref<64x64xf32, #tpu.memory_space<vmem>>, %arg9: memref<1x64xf32, #tpu.memory_space<vmem>>, %arg10: memref<1x64xf32, #tpu.memory_space<vmem>>, %arg11: memref<1x64xf32, #tpu.memory_space<vmem>>, %arg12: memref<64x32xf32, #tpu.memory_space<vmem>>, %arg13: memref<1x32xf32, #tpu.memory_space<vmem>>, %arg14: memref<32x32xf32, #tpu.memory_space<vmem>>, %arg15: memref<32x32xf32, #tpu.memory_space<vmem>>, %arg16: memref<32x32xf32, #tpu.memory_space<vmem>>, %arg17: memref<32x32xf32, #tpu.memory_space<vmem>>, %arg18: memref<1x32xf32, #tpu.memory_space<vmem>>, %arg19: memref<1x32xf32, #tpu.memory_space<vmem>>, %arg20: memref<1x32xf32, #tpu.memory_space<vmem>>, %arg21: memref<1x32xf32, #tpu.memory_space<vmem>>, %arg22: memref<32x32xf32, #tpu.memory_space<vmem>>, %arg23: memref<32x32xf32, #tpu.memory_space<vmem>>, %arg24: memref<32x32xf32, #tpu.memory_space<vmem>>, %arg25: memref<32x32xf32, #tpu.memory_space<vmem>>, %arg26: memref<1x32xf32, #tpu.memory_space<vmem>>, %arg27: memref<1x32xf32, #tpu.memory_space<vmem>>, %arg28: memref<1x32xf32, #tpu.memory_space<vmem>>, %arg29: memref<1x32xf32, #tpu.memory_space<vmem>>, %arg30: memref<32x32xf32, #tpu.memory_space<vmem>>, %arg31: memref<32x32xf32, #tpu.memory_space<vmem>>, %arg32: memref<1x32xf32, #tpu.memory_space<vmem>>, %arg33: memref<1x32xf32, #tpu.memory_space<vmem>>, %arg34: memref<1x32xf32, #tpu.memory_space<vmem>>, %arg35: memref<32x32xf32, #tpu.memory_space<vmem>>, %arg36: memref<32x32xf32, #tpu.memory_space<vmem>>, %arg37: memref<1x32xf32, #tpu.memory_space<vmem>>, %arg38: memref<1x32xf32, #tpu.memory_space<vmem>>, %arg39: memref<1x32xf32, #tpu.memory_space<vmem>>, %arg40: memref<32x6xf32, #tpu.memory_space<vmem>>, %arg41: memref<1x6xf32, #tpu.memory_space<vmem>>, %arg42: memref<32x6xf32, #tpu.memory_space<vmem>>, %arg43: memref<1x6xf32, #tpu.memory_space<vmem>>, %arg44: memref<32x6xf32, #tpu.memory_space<vmem>>, %arg45: memref<32x6xf32, #tpu.memory_space<vmem>>, %arg46: memref<1x6xf32, #tpu.memory_space<vmem>>, %arg47: memref<8x256xf32, #tpu.memory_space<vmem>>) attributes {dimension_semantics = [], scalar_prefetch = 0 : i64, scratch_operands = 0 : i64, tpu.core_type = #tpu.core_type<tc>} {
    %c0 = arith.constant 0 : index
    %c0_0 = arith.constant 0 : index
    %0 = vector.load %arg0[%c0, %c0_0] : memref<8x48xf32, #tpu.memory_space<vmem>>, vector<8x48xf32>
    %c0_1 = arith.constant 0 : index
    %c0_2 = arith.constant 0 : index
    %1 = vector.load %arg2[%c0_1, %c0_2] : memref<48x64xf32, #tpu.memory_space<vmem>>, vector<48x64xf32>
    %c0_3 = arith.constant 0 : index
    %c0_4 = arith.constant 0 : index
    %2 = vector.load %arg3[%c0_3, %c0_4] : memref<1x64xf32, #tpu.memory_space<vmem>>, vector<1x64xf32>
    %c0_5 = arith.constant 0 : index
    %c0_6 = arith.constant 0 : index
    %3 = vector.load %arg4[%c0_5, %c0_6] : memref<1x64xf32, #tpu.memory_space<vmem>>, vector<1x64xf32>
    %c0_7 = arith.constant 0 : index
    %c0_8 = arith.constant 0 : index
    %4 = vector.load %arg5[%c0_7, %c0_8] : memref<1x64xf32, #tpu.memory_space<vmem>>, vector<1x64xf32>
    %c0_9 = arith.constant 0 : index
    %c0_10 = arith.constant 0 : index
    %5 = vector.load %arg6[%c0_9, %c0_10] : memref<64x32xf32, #tpu.memory_space<vmem>>, vector<64x32xf32>
    %c0_11 = arith.constant 0 : index
    %c0_12 = arith.constant 0 : index
    %6 = vector.load %arg7[%c0_11, %c0_12] : memref<1x32xf32, #tpu.memory_space<vmem>>, vector<1x32xf32>
    %cst = arith.constant dense<0.000000e+00> : vector<8x64xf32>
    %7 = tpu.matmul %0, %1, %cst {dimension_numbers = #tpu.dot_dimension_numbers<[1], [0], [0], [1], [0, 0, 1, 1], [], []>} : vector<8x48xf32>, vector<48x64xf32>, vector<8x64xf32> -> vector<8x64xf32>
    %8 = vector.broadcast %2 : vector<1x64xf32> to vector<8x64xf32>
    %9 = arith.addf %7, %8 : vector<8x64xf32>
    %cst_13 = arith.constant dense<0.000000e+00> : vector<8xf32>
    %10 = vector.multi_reduction <add>, %9, %cst_13 [1] : vector<8x64xf32> to vector<8xf32>
    %11 = vector.shape_cast %10 : vector<8xf32> to vector<8x1xf32>
    %cst_14 = arith.constant 6.400000e+01 : f32
    %12 = vector.broadcast %cst_14 : f32 to vector<8x1xf32>
    %13 = arith.divf %11, %12 : vector<8x1xf32>
    %14 = vector.broadcast %13 : vector<8x1xf32> to vector<8x64xf32>
    %15 = arith.subf %9, %14 : vector<8x64xf32>
    %16 = arith.mulf %15, %15 : vector<8x64xf32>
    %cst_15 = arith.constant dense<0.000000e+00> : vector<8xf32>
    %17 = vector.multi_reduction <add>, %16, %cst_15 [1] : vector<8x64xf32> to vector<8xf32>
    %18 = vector.shape_cast %17 : vector<8xf32> to vector<8x1xf32>
    %cst_16 = arith.constant 6.400000e+01 : f32
    %19 = vector.broadcast %cst_16 : f32 to vector<8x1xf32>
    %20 = arith.divf %18, %19 : vector<8x1xf32>
    %21 = vector.broadcast %13 : vector<8x1xf32> to vector<8x64xf32>
    %22 = arith.subf %9, %21 : vector<8x64xf32>
    %cst_17 = arith.constant 9.99999974E-6 : f32
    %23 = vector.broadcast %cst_17 : f32 to vector<8x1xf32>
    %24 = arith.addf %20, %23 : vector<8x1xf32>
    %25 = math.rsqrt %24 : vector<8x1xf32>
    %26 = vector.broadcast %25 : vector<8x1xf32> to vector<8x64xf32>
    %27 = arith.mulf %22, %26 : vector<8x64xf32>
    %28 = vector.broadcast %3 : vector<1x64xf32> to vector<8x64xf32>
    %29 = arith.mulf %27, %28 : vector<8x64xf32>
    %30 = vector.broadcast %4 : vector<1x64xf32> to vector<8x64xf32>
    %31 = arith.addf %29, %30 : vector<8x64xf32>
    %32 = arith.mulf %31, %31 : vector<8x64xf32>
    %33 = arith.mulf %31, %32 : vector<8x64xf32>
    %cst_18 = arith.constant 4.471500e-02 : f32
    %34 = vector.broadcast %cst_18 : f32 to vector<8x64xf32>
    %35 = arith.mulf %34, %33 : vector<8x64xf32>
    %36 = arith.addf %31, %35 : vector<8x64xf32>
    %cst_19 = arith.constant 0.797884583 : f32
    %37 = vector.broadcast %cst_19 : f32 to vector<8x64xf32>
    %38 = arith.mulf %37, %36 : vector<8x64xf32>
    %39 = math.tanh %38 : vector<8x64xf32>
    %cst_20 = arith.constant 1.000000e+00 : f32
    %40 = vector.broadcast %cst_20 : f32 to vector<8x64xf32>
    %41 = arith.addf %40, %39 : vector<8x64xf32>
    %cst_21 = arith.constant 5.000000e-01 : f32
    %42 = vector.broadcast %cst_21 : f32 to vector<8x64xf32>
    %43 = arith.mulf %42, %41 : vector<8x64xf32>
    %44 = arith.mulf %31, %43 : vector<8x64xf32>
    %cst_22 = arith.constant dense<0.000000e+00> : vector<8x32xf32>
    %45 = tpu.matmul %44, %5, %cst_22 {dimension_numbers = #tpu.dot_dimension_numbers<[1], [0], [0], [1], [0, 0, 1, 1], [], []>} : vector<8x64xf32>, vector<64x32xf32>, vector<8x32xf32> -> vector<8x32xf32>
    %46 = vector.broadcast %6 : vector<1x32xf32> to vector<8x32xf32>
    %47 = arith.addf %45, %46 : vector<8x32xf32>
    %c0_23 = arith.constant 0 : index
    %c0_24 = arith.constant 0 : index
    %48 = vector.load %arg1[%c0_23, %c0_24] : memref<8x64xf32, #tpu.memory_space<vmem>>, vector<8x64xf32>
    %c0_25 = arith.constant 0 : index
    %c0_26 = arith.constant 0 : index
    %49 = vector.load %arg8[%c0_25, %c0_26] : memref<64x64xf32, #tpu.memory_space<vmem>>, vector<64x64xf32>
    %c0_27 = arith.constant 0 : index
    %c0_28 = arith.constant 0 : index
    %50 = vector.load %arg9[%c0_27, %c0_28] : memref<1x64xf32, #tpu.memory_space<vmem>>, vector<1x64xf32>
    %c0_29 = arith.constant 0 : index
    %c0_30 = arith.constant 0 : index
    %51 = vector.load %arg10[%c0_29, %c0_30] : memref<1x64xf32, #tpu.memory_space<vmem>>, vector<1x64xf32>
    %c0_31 = arith.constant 0 : index
    %c0_32 = arith.constant 0 : index
    %52 = vector.load %arg11[%c0_31, %c0_32] : memref<1x64xf32, #tpu.memory_space<vmem>>, vector<1x64xf32>
    %c0_33 = arith.constant 0 : index
    %c0_34 = arith.constant 0 : index
    %53 = vector.load %arg12[%c0_33, %c0_34] : memref<64x32xf32, #tpu.memory_space<vmem>>, vector<64x32xf32>
    %c0_35 = arith.constant 0 : index
    %c0_36 = arith.constant 0 : index
    %54 = vector.load %arg13[%c0_35, %c0_36] : memref<1x32xf32, #tpu.memory_space<vmem>>, vector<1x32xf32>
    %cst_37 = arith.constant dense<0.000000e+00> : vector<8x64xf32>
    %55 = tpu.matmul %48, %49, %cst_37 {dimension_numbers = #tpu.dot_dimension_numbers<[1], [0], [0], [1], [0, 0, 1, 1], [], []>} : vector<8x64xf32>, vector<64x64xf32>, vector<8x64xf32> -> vector<8x64xf32>
    %56 = vector.broadcast %50 : vector<1x64xf32> to vector<8x64xf32>
    %57 = arith.addf %55, %56 : vector<8x64xf32>
    %cst_38 = arith.constant dense<0.000000e+00> : vector<8xf32>
    %58 = vector.multi_reduction <add>, %57, %cst_38 [1] : vector<8x64xf32> to vector<8xf32>
    %59 = vector.shape_cast %58 : vector<8xf32> to vector<8x1xf32>
    %cst_39 = arith.constant 6.400000e+01 : f32
    %60 = vector.broadcast %cst_39 : f32 to vector<8x1xf32>
    %61 = arith.divf %59, %60 : vector<8x1xf32>
    %62 = vector.broadcast %61 : vector<8x1xf32> to vector<8x64xf32>
    %63 = arith.subf %57, %62 : vector<8x64xf32>
    %64 = arith.mulf %63, %63 : vector<8x64xf32>
    %cst_40 = arith.constant dense<0.000000e+00> : vector<8xf32>
    %65 = vector.multi_reduction <add>, %64, %cst_40 [1] : vector<8x64xf32> to vector<8xf32>
    %66 = vector.shape_cast %65 : vector<8xf32> to vector<8x1xf32>
    %cst_41 = arith.constant 6.400000e+01 : f32
    %67 = vector.broadcast %cst_41 : f32 to vector<8x1xf32>
    %68 = arith.divf %66, %67 : vector<8x1xf32>
    %69 = vector.broadcast %61 : vector<8x1xf32> to vector<8x64xf32>
    %70 = arith.subf %57, %69 : vector<8x64xf32>
    %cst_42 = arith.constant 9.99999974E-6 : f32
    %71 = vector.broadcast %cst_42 : f32 to vector<8x1xf32>
    %72 = arith.addf %68, %71 : vector<8x1xf32>
    %73 = math.rsqrt %72 : vector<8x1xf32>
    %74 = vector.broadcast %73 : vector<8x1xf32> to vector<8x64xf32>
    %75 = arith.mulf %70, %74 : vector<8x64xf32>
    %76 = vector.broadcast %51 : vector<1x64xf32> to vector<8x64xf32>
    %77 = arith.mulf %75, %76 : vector<8x64xf32>
    %78 = vector.broadcast %52 : vector<1x64xf32> to vector<8x64xf32>
    %79 = arith.addf %77, %78 : vector<8x64xf32>
    %80 = arith.mulf %79, %79 : vector<8x64xf32>
    %81 = arith.mulf %79, %80 : vector<8x64xf32>
    %cst_43 = arith.constant 4.471500e-02 : f32
    %82 = vector.broadcast %cst_43 : f32 to vector<8x64xf32>
    %83 = arith.mulf %82, %81 : vector<8x64xf32>
    %84 = arith.addf %79, %83 : vector<8x64xf32>
    %cst_44 = arith.constant 0.797884583 : f32
    %85 = vector.broadcast %cst_44 : f32 to vector<8x64xf32>
    %86 = arith.mulf %85, %84 : vector<8x64xf32>
    %87 = math.tanh %86 : vector<8x64xf32>
    %cst_45 = arith.constant 1.000000e+00 : f32
    %88 = vector.broadcast %cst_45 : f32 to vector<8x64xf32>
    %89 = arith.addf %88, %87 : vector<8x64xf32>
    %cst_46 = arith.constant 5.000000e-01 : f32
    %90 = vector.broadcast %cst_46 : f32 to vector<8x64xf32>
    %91 = arith.mulf %90, %89 : vector<8x64xf32>
    %92 = arith.mulf %79, %91 : vector<8x64xf32>
    %cst_47 = arith.constant dense<0.000000e+00> : vector<8x32xf32>
    %93 = tpu.matmul %92, %53, %cst_47 {dimension_numbers = #tpu.dot_dimension_numbers<[1], [0], [0], [1], [0, 0, 1, 1], [], []>} : vector<8x64xf32>, vector<64x32xf32>, vector<8x32xf32> -> vector<8x32xf32>
    %94 = vector.broadcast %54 : vector<1x32xf32> to vector<8x32xf32>
    %95 = arith.addf %93, %94 : vector<8x32xf32>
    %c0_48 = arith.constant 0 : index
    %c0_49 = arith.constant 0 : index
    %96 = vector.load %arg14[%c0_48, %c0_49] : memref<32x32xf32, #tpu.memory_space<vmem>>, vector<32x32xf32>
    %c0_50 = arith.constant 0 : index
    %c0_51 = arith.constant 0 : index
    %97 = vector.load %arg15[%c0_50, %c0_51] : memref<32x32xf32, #tpu.memory_space<vmem>>, vector<32x32xf32>
    %c0_52 = arith.constant 0 : index
    %c0_53 = arith.constant 0 : index
    %98 = vector.load %arg16[%c0_52, %c0_53] : memref<32x32xf32, #tpu.memory_space<vmem>>, vector<32x32xf32>
    %c0_54 = arith.constant 0 : index
    %c0_55 = arith.constant 0 : index
    %99 = vector.load %arg17[%c0_54, %c0_55] : memref<32x32xf32, #tpu.memory_space<vmem>>, vector<32x32xf32>
    %c0_56 = arith.constant 0 : index
    %c0_57 = arith.constant 0 : index
    %100 = vector.load %arg18[%c0_56, %c0_57] : memref<1x32xf32, #tpu.memory_space<vmem>>, vector<1x32xf32>
    %c0_58 = arith.constant 0 : index
    %c0_59 = arith.constant 0 : index
    %101 = vector.load %arg19[%c0_58, %c0_59] : memref<1x32xf32, #tpu.memory_space<vmem>>, vector<1x32xf32>
    %c0_60 = arith.constant 0 : index
    %c0_61 = arith.constant 0 : index
    %102 = vector.load %arg20[%c0_60, %c0_61] : memref<1x32xf32, #tpu.memory_space<vmem>>, vector<1x32xf32>
    %c0_62 = arith.constant 0 : index
    %c0_63 = arith.constant 0 : index
    %103 = vector.load %arg21[%c0_62, %c0_63] : memref<1x32xf32, #tpu.memory_space<vmem>>, vector<1x32xf32>
    %cst_64 = arith.constant dense<0.000000e+00> : vector<8x32xf32>
    %104 = tpu.matmul %47, %96, %cst_64 {dimension_numbers = #tpu.dot_dimension_numbers<[1], [0], [0], [1], [0, 0, 1, 1], [], []>} : vector<8x32xf32>, vector<32x32xf32>, vector<8x32xf32> -> vector<8x32xf32>
    %105 = vector.broadcast %100 : vector<1x32xf32> to vector<8x32xf32>
    %106 = arith.addf %104, %105 : vector<8x32xf32>
    %cst_65 = arith.constant 0.353553385 : f32
    %107 = vector.broadcast %cst_65 : f32 to vector<8x32xf32>
    %108 = arith.mulf %106, %107 : vector<8x32xf32>
    %cst_66 = arith.constant dense<0.000000e+00> : vector<8x32xf32>
    %109 = tpu.matmul %95, %97, %cst_66 {dimension_numbers = #tpu.dot_dimension_numbers<[1], [0], [0], [1], [0, 0, 1, 1], [], []>} : vector<8x32xf32>, vector<32x32xf32>, vector<8x32xf32> -> vector<8x32xf32>
    %110 = vector.broadcast %101 : vector<1x32xf32> to vector<8x32xf32>
    %111 = arith.addf %109, %110 : vector<8x32xf32>
    %cst_67 = arith.constant dense<0.000000e+00> : vector<8x32xf32>
    %112 = tpu.matmul %95, %98, %cst_67 {dimension_numbers = #tpu.dot_dimension_numbers<[1], [0], [0], [1], [0, 0, 1, 1], [], []>} : vector<8x32xf32>, vector<32x32xf32>, vector<8x32xf32> -> vector<8x32xf32>
    %113 = vector.broadcast %102 : vector<1x32xf32> to vector<8x32xf32>
    %114 = arith.addf %112, %113 : vector<8x32xf32>
    %115 = vector.extract_strided_slice %108 {offsets = [0, 0], sizes = [8, 8], strides = [1, 1]} : vector<8x32xf32> to vector<8x8xf32>
    %116 = vector.extract_strided_slice %111 {offsets = [0, 0], sizes = [8, 8], strides = [1, 1]} : vector<8x32xf32> to vector<8x8xf32>
    %117 = vector.extract_strided_slice %114 {offsets = [0, 0], sizes = [8, 8], strides = [1, 1]} : vector<8x32xf32> to vector<8x8xf32>
    %cst_68 = arith.constant dense<0.000000e+00> : vector<8x8xf32>
    %118 = tpu.matmul %115, %116, %cst_68 {dimension_numbers = #tpu.dot_dimension_numbers<[1], [1], [0], [0], [0, 0, 1, 0], [], []>} : vector<8x8xf32>, vector<8x8xf32>, vector<8x8xf32> -> vector<8x8xf32>
    %cst_69 = arith.constant dense<0xFF800000> : vector<8xf32>
    %119 = vector.multi_reduction <maximumf>, %118, %cst_69 [1] : vector<8x8xf32> to vector<8xf32>
    %120 = vector.shape_cast %119 : vector<8xf32> to vector<8x1xf32>
    %121 = vector.broadcast %120 : vector<8x1xf32> to vector<8x8xf32>
    %122 = arith.subf %118, %121 : vector<8x8xf32>
    %123 = math.exp %122 : vector<8x8xf32>
    %cst_70 = arith.constant dense<0.000000e+00> : vector<8xf32>
    %124 = vector.multi_reduction <add>, %123, %cst_70 [1] : vector<8x8xf32> to vector<8xf32>
    %125 = vector.shape_cast %124 : vector<8xf32> to vector<8x1xf32>
    %126 = tpu.reciprocal %125 {approx = true} : vector<8x1xf32> -> vector<8x1xf32>
    %127 = vector.broadcast %126 : vector<8x1xf32> to vector<8x8xf32>
    %128 = arith.mulf %123, %127 : vector<8x8xf32>
    %cst_71 = arith.constant dense<0.000000e+00> : vector<8x8xf32>
    %129 = tpu.matmul %128, %117, %cst_71 {dimension_numbers = #tpu.dot_dimension_numbers<[1], [0], [0], [1], [0, 0, 1, 1], [], []>} : vector<8x8xf32>, vector<8x8xf32>, vector<8x8xf32> -> vector<8x8xf32>
    %130 = vector.extract_strided_slice %99 {offsets = [0, 0], sizes = [8, 32], strides = [1, 1]} : vector<32x32xf32> to vector<8x32xf32>
    %cst_72 = arith.constant dense<0.000000e+00> : vector<8x32xf32>
    %131 = tpu.matmul %129, %130, %cst_72 {dimension_numbers = #tpu.dot_dimension_numbers<[1], [0], [0], [1], [0, 0, 1, 1], [], []>} : vector<8x8xf32>, vector<8x32xf32>, vector<8x32xf32> -> vector<8x32xf32>
    %132 = vector.extract_strided_slice %108 {offsets = [0, 8], sizes = [8, 8], strides = [1, 1]} : vector<8x32xf32> to vector<8x8xf32>
    %133 = vector.extract_strided_slice %111 {offsets = [0, 8], sizes = [8, 8], strides = [1, 1]} : vector<8x32xf32> to vector<8x8xf32>
    %134 = vector.extract_strided_slice %114 {offsets = [0, 8], sizes = [8, 8], strides = [1, 1]} : vector<8x32xf32> to vector<8x8xf32>
    %cst_73 = arith.constant dense<0.000000e+00> : vector<8x8xf32>
    %135 = tpu.matmul %132, %133, %cst_73 {dimension_numbers = #tpu.dot_dimension_numbers<[1], [1], [0], [0], [0, 0, 1, 0], [], []>} : vector<8x8xf32>, vector<8x8xf32>, vector<8x8xf32> -> vector<8x8xf32>
    %cst_74 = arith.constant dense<0xFF800000> : vector<8xf32>
    %136 = vector.multi_reduction <maximumf>, %135, %cst_74 [1] : vector<8x8xf32> to vector<8xf32>
    %137 = vector.shape_cast %136 : vector<8xf32> to vector<8x1xf32>
    %138 = vector.broadcast %137 : vector<8x1xf32> to vector<8x8xf32>
    %139 = arith.subf %135, %138 : vector<8x8xf32>
    %140 = math.exp %139 : vector<8x8xf32>
    %cst_75 = arith.constant dense<0.000000e+00> : vector<8xf32>
    %141 = vector.multi_reduction <add>, %140, %cst_75 [1] : vector<8x8xf32> to vector<8xf32>
    %142 = vector.shape_cast %141 : vector<8xf32> to vector<8x1xf32>
    %143 = tpu.reciprocal %142 {approx = true} : vector<8x1xf32> -> vector<8x1xf32>
    %144 = vector.broadcast %143 : vector<8x1xf32> to vector<8x8xf32>
    %145 = arith.mulf %140, %144 : vector<8x8xf32>
    %cst_76 = arith.constant dense<0.000000e+00> : vector<8x8xf32>
    %146 = tpu.matmul %145, %134, %cst_76 {dimension_numbers = #tpu.dot_dimension_numbers<[1], [0], [0], [1], [0, 0, 1, 1], [], []>} : vector<8x8xf32>, vector<8x8xf32>, vector<8x8xf32> -> vector<8x8xf32>
    %147 = vector.extract_strided_slice %99 {offsets = [8, 0], sizes = [8, 32], strides = [1, 1]} : vector<32x32xf32> to vector<8x32xf32>
    %cst_77 = arith.constant dense<0.000000e+00> : vector<8x32xf32>
    %148 = tpu.matmul %146, %147, %cst_77 {dimension_numbers = #tpu.dot_dimension_numbers<[1], [0], [0], [1], [0, 0, 1, 1], [], []>} : vector<8x8xf32>, vector<8x32xf32>, vector<8x32xf32> -> vector<8x32xf32>
    %149 = arith.addf %131, %148 : vector<8x32xf32>
    %150 = vector.extract_strided_slice %108 {offsets = [0, 16], sizes = [8, 8], strides = [1, 1]} : vector<8x32xf32> to vector<8x8xf32>
    %151 = vector.extract_strided_slice %111 {offsets = [0, 16], sizes = [8, 8], strides = [1, 1]} : vector<8x32xf32> to vector<8x8xf32>
    %152 = vector.extract_strided_slice %114 {offsets = [0, 16], sizes = [8, 8], strides = [1, 1]} : vector<8x32xf32> to vector<8x8xf32>
    %cst_78 = arith.constant dense<0.000000e+00> : vector<8x8xf32>
    %153 = tpu.matmul %150, %151, %cst_78 {dimension_numbers = #tpu.dot_dimension_numbers<[1], [1], [0], [0], [0, 0, 1, 0], [], []>} : vector<8x8xf32>, vector<8x8xf32>, vector<8x8xf32> -> vector<8x8xf32>
    %cst_79 = arith.constant dense<0xFF800000> : vector<8xf32>
    %154 = vector.multi_reduction <maximumf>, %153, %cst_79 [1] : vector<8x8xf32> to vector<8xf32>
    %155 = vector.shape_cast %154 : vector<8xf32> to vector<8x1xf32>
    %156 = vector.broadcast %155 : vector<8x1xf32> to vector<8x8xf32>
    %157 = arith.subf %153, %156 : vector<8x8xf32>
    %158 = math.exp %157 : vector<8x8xf32>
    %cst_80 = arith.constant dense<0.000000e+00> : vector<8xf32>
    %159 = vector.multi_reduction <add>, %158, %cst_80 [1] : vector<8x8xf32> to vector<8xf32>
    %160 = vector.shape_cast %159 : vector<8xf32> to vector<8x1xf32>
    %161 = tpu.reciprocal %160 {approx = true} : vector<8x1xf32> -> vector<8x1xf32>
    %162 = vector.broadcast %161 : vector<8x1xf32> to vector<8x8xf32>
    %163 = arith.mulf %158, %162 : vector<8x8xf32>
    %cst_81 = arith.constant dense<0.000000e+00> : vector<8x8xf32>
    %164 = tpu.matmul %163, %152, %cst_81 {dimension_numbers = #tpu.dot_dimension_numbers<[1], [0], [0], [1], [0, 0, 1, 1], [], []>} : vector<8x8xf32>, vector<8x8xf32>, vector<8x8xf32> -> vector<8x8xf32>
    %165 = vector.extract_strided_slice %99 {offsets = [16, 0], sizes = [8, 32], strides = [1, 1]} : vector<32x32xf32> to vector<8x32xf32>
    %cst_82 = arith.constant dense<0.000000e+00> : vector<8x32xf32>
    %166 = tpu.matmul %164, %165, %cst_82 {dimension_numbers = #tpu.dot_dimension_numbers<[1], [0], [0], [1], [0, 0, 1, 1], [], []>} : vector<8x8xf32>, vector<8x32xf32>, vector<8x32xf32> -> vector<8x32xf32>
    %167 = arith.addf %149, %166 : vector<8x32xf32>
    %168 = vector.extract_strided_slice %108 {offsets = [0, 24], sizes = [8, 8], strides = [1, 1]} : vector<8x32xf32> to vector<8x8xf32>
    %169 = vector.extract_strided_slice %111 {offsets = [0, 24], sizes = [8, 8], strides = [1, 1]} : vector<8x32xf32> to vector<8x8xf32>
    %170 = vector.extract_strided_slice %114 {offsets = [0, 24], sizes = [8, 8], strides = [1, 1]} : vector<8x32xf32> to vector<8x8xf32>
    %cst_83 = arith.constant dense<0.000000e+00> : vector<8x8xf32>
    %171 = tpu.matmul %168, %169, %cst_83 {dimension_numbers = #tpu.dot_dimension_numbers<[1], [1], [0], [0], [0, 0, 1, 0], [], []>} : vector<8x8xf32>, vector<8x8xf32>, vector<8x8xf32> -> vector<8x8xf32>
    %cst_84 = arith.constant dense<0xFF800000> : vector<8xf32>
    %172 = vector.multi_reduction <maximumf>, %171, %cst_84 [1] : vector<8x8xf32> to vector<8xf32>
    %173 = vector.shape_cast %172 : vector<8xf32> to vector<8x1xf32>
    %174 = vector.broadcast %173 : vector<8x1xf32> to vector<8x8xf32>
    %175 = arith.subf %171, %174 : vector<8x8xf32>
    %176 = math.exp %175 : vector<8x8xf32>
    %cst_85 = arith.constant dense<0.000000e+00> : vector<8xf32>
    %177 = vector.multi_reduction <add>, %176, %cst_85 [1] : vector<8x8xf32> to vector<8xf32>
    %178 = vector.shape_cast %177 : vector<8xf32> to vector<8x1xf32>
    %179 = tpu.reciprocal %178 {approx = true} : vector<8x1xf32> -> vector<8x1xf32>
    %180 = vector.broadcast %179 : vector<8x1xf32> to vector<8x8xf32>
    %181 = arith.mulf %176, %180 : vector<8x8xf32>
    %cst_86 = arith.constant dense<0.000000e+00> : vector<8x8xf32>
    %182 = tpu.matmul %181, %170, %cst_86 {dimension_numbers = #tpu.dot_dimension_numbers<[1], [0], [0], [1], [0, 0, 1, 1], [], []>} : vector<8x8xf32>, vector<8x8xf32>, vector<8x8xf32> -> vector<8x8xf32>
    %183 = vector.extract_strided_slice %99 {offsets = [24, 0], sizes = [8, 32], strides = [1, 1]} : vector<32x32xf32> to vector<8x32xf32>
    %cst_87 = arith.constant dense<0.000000e+00> : vector<8x32xf32>
    %184 = tpu.matmul %182, %183, %cst_87 {dimension_numbers = #tpu.dot_dimension_numbers<[1], [0], [0], [1], [0, 0, 1, 1], [], []>} : vector<8x8xf32>, vector<8x32xf32>, vector<8x32xf32> -> vector<8x32xf32>
    %185 = arith.addf %167, %184 : vector<8x32xf32>
    %186 = vector.broadcast %103 : vector<1x32xf32> to vector<8x32xf32>
    %187 = arith.addf %185, %186 : vector<8x32xf32>
    %c0_88 = arith.constant 0 : index
    %c0_89 = arith.constant 0 : index
    %188 = vector.load %arg22[%c0_88, %c0_89] : memref<32x32xf32, #tpu.memory_space<vmem>>, vector<32x32xf32>
    %c0_90 = arith.constant 0 : index
    %c0_91 = arith.constant 0 : index
    %189 = vector.load %arg23[%c0_90, %c0_91] : memref<32x32xf32, #tpu.memory_space<vmem>>, vector<32x32xf32>
    %c0_92 = arith.constant 0 : index
    %c0_93 = arith.constant 0 : index
    %190 = vector.load %arg24[%c0_92, %c0_93] : memref<32x32xf32, #tpu.memory_space<vmem>>, vector<32x32xf32>
    %c0_94 = arith.constant 0 : index
    %c0_95 = arith.constant 0 : index
    %191 = vector.load %arg25[%c0_94, %c0_95] : memref<32x32xf32, #tpu.memory_space<vmem>>, vector<32x32xf32>
    %c0_96 = arith.constant 0 : index
    %c0_97 = arith.constant 0 : index
    %192 = vector.load %arg26[%c0_96, %c0_97] : memref<1x32xf32, #tpu.memory_space<vmem>>, vector<1x32xf32>
    %c0_98 = arith.constant 0 : index
    %c0_99 = arith.constant 0 : index
    %193 = vector.load %arg27[%c0_98, %c0_99] : memref<1x32xf32, #tpu.memory_space<vmem>>, vector<1x32xf32>
    %c0_100 = arith.constant 0 : index
    %c0_101 = arith.constant 0 : index
    %194 = vector.load %arg28[%c0_100, %c0_101] : memref<1x32xf32, #tpu.memory_space<vmem>>, vector<1x32xf32>
    %c0_102 = arith.constant 0 : index
    %c0_103 = arith.constant 0 : index
    %195 = vector.load %arg29[%c0_102, %c0_103] : memref<1x32xf32, #tpu.memory_space<vmem>>, vector<1x32xf32>
    %cst_104 = arith.constant dense<0.000000e+00> : vector<8x32xf32>
    %196 = tpu.matmul %95, %188, %cst_104 {dimension_numbers = #tpu.dot_dimension_numbers<[1], [0], [0], [1], [0, 0, 1, 1], [], []>} : vector<8x32xf32>, vector<32x32xf32>, vector<8x32xf32> -> vector<8x32xf32>
    %197 = vector.broadcast %192 : vector<1x32xf32> to vector<8x32xf32>
    %198 = arith.addf %196, %197 : vector<8x32xf32>
    %cst_105 = arith.constant 0.353553385 : f32
    %199 = vector.broadcast %cst_105 : f32 to vector<8x32xf32>
    %200 = arith.mulf %198, %199 : vector<8x32xf32>
    %cst_106 = arith.constant dense<0.000000e+00> : vector<8x32xf32>
    %201 = tpu.matmul %47, %189, %cst_106 {dimension_numbers = #tpu.dot_dimension_numbers<[1], [0], [0], [1], [0, 0, 1, 1], [], []>} : vector<8x32xf32>, vector<32x32xf32>, vector<8x32xf32> -> vector<8x32xf32>
    %202 = vector.broadcast %193 : vector<1x32xf32> to vector<8x32xf32>
    %203 = arith.addf %201, %202 : vector<8x32xf32>
    %cst_107 = arith.constant dense<0.000000e+00> : vector<8x32xf32>
    %204 = tpu.matmul %47, %190, %cst_107 {dimension_numbers = #tpu.dot_dimension_numbers<[1], [0], [0], [1], [0, 0, 1, 1], [], []>} : vector<8x32xf32>, vector<32x32xf32>, vector<8x32xf32> -> vector<8x32xf32>
    %205 = vector.broadcast %194 : vector<1x32xf32> to vector<8x32xf32>
    %206 = arith.addf %204, %205 : vector<8x32xf32>
    %207 = vector.extract_strided_slice %200 {offsets = [0, 0], sizes = [8, 8], strides = [1, 1]} : vector<8x32xf32> to vector<8x8xf32>
    %208 = vector.extract_strided_slice %203 {offsets = [0, 0], sizes = [8, 8], strides = [1, 1]} : vector<8x32xf32> to vector<8x8xf32>
    %209 = vector.extract_strided_slice %206 {offsets = [0, 0], sizes = [8, 8], strides = [1, 1]} : vector<8x32xf32> to vector<8x8xf32>
    %cst_108 = arith.constant dense<0.000000e+00> : vector<8x8xf32>
    %210 = tpu.matmul %207, %208, %cst_108 {dimension_numbers = #tpu.dot_dimension_numbers<[1], [1], [0], [0], [0, 0, 1, 0], [], []>} : vector<8x8xf32>, vector<8x8xf32>, vector<8x8xf32> -> vector<8x8xf32>
    %cst_109 = arith.constant dense<0xFF800000> : vector<8xf32>
    %211 = vector.multi_reduction <maximumf>, %210, %cst_109 [1] : vector<8x8xf32> to vector<8xf32>
    %212 = vector.shape_cast %211 : vector<8xf32> to vector<8x1xf32>
    %213 = vector.broadcast %212 : vector<8x1xf32> to vector<8x8xf32>
    %214 = arith.subf %210, %213 : vector<8x8xf32>
    %215 = math.exp %214 : vector<8x8xf32>
    %cst_110 = arith.constant dense<0.000000e+00> : vector<8xf32>
    %216 = vector.multi_reduction <add>, %215, %cst_110 [1] : vector<8x8xf32> to vector<8xf32>
    %217 = vector.shape_cast %216 : vector<8xf32> to vector<8x1xf32>
    %218 = tpu.reciprocal %217 {approx = true} : vector<8x1xf32> -> vector<8x1xf32>
    %219 = vector.broadcast %218 : vector<8x1xf32> to vector<8x8xf32>
    %220 = arith.mulf %215, %219 : vector<8x8xf32>
    %cst_111 = arith.constant dense<0.000000e+00> : vector<8x8xf32>
    %221 = tpu.matmul %220, %209, %cst_111 {dimension_numbers = #tpu.dot_dimension_numbers<[1], [0], [0], [1], [0, 0, 1, 1], [], []>} : vector<8x8xf32>, vector<8x8xf32>, vector<8x8xf32> -> vector<8x8xf32>
    %222 = vector.extract_strided_slice %191 {offsets = [0, 0], sizes = [8, 32], strides = [1, 1]} : vector<32x32xf32> to vector<8x32xf32>
    %cst_112 = arith.constant dense<0.000000e+00> : vector<8x32xf32>
    %223 = tpu.matmul %221, %222, %cst_112 {dimension_numbers = #tpu.dot_dimension_numbers<[1], [0], [0], [1], [0, 0, 1, 1], [], []>} : vector<8x8xf32>, vector<8x32xf32>, vector<8x32xf32> -> vector<8x32xf32>
    %224 = vector.extract_strided_slice %200 {offsets = [0, 8], sizes = [8, 8], strides = [1, 1]} : vector<8x32xf32> to vector<8x8xf32>
    %225 = vector.extract_strided_slice %203 {offsets = [0, 8], sizes = [8, 8], strides = [1, 1]} : vector<8x32xf32> to vector<8x8xf32>
    %226 = vector.extract_strided_slice %206 {offsets = [0, 8], sizes = [8, 8], strides = [1, 1]} : vector<8x32xf32> to vector<8x8xf32>
    %cst_113 = arith.constant dense<0.000000e+00> : vector<8x8xf32>
    %227 = tpu.matmul %224, %225, %cst_113 {dimension_numbers = #tpu.dot_dimension_numbers<[1], [1], [0], [0], [0, 0, 1, 0], [], []>} : vector<8x8xf32>, vector<8x8xf32>, vector<8x8xf32> -> vector<8x8xf32>
    %cst_114 = arith.constant dense<0xFF800000> : vector<8xf32>
    %228 = vector.multi_reduction <maximumf>, %227, %cst_114 [1] : vector<8x8xf32> to vector<8xf32>
    %229 = vector.shape_cast %228 : vector<8xf32> to vector<8x1xf32>
    %230 = vector.broadcast %229 : vector<8x1xf32> to vector<8x8xf32>
    %231 = arith.subf %227, %230 : vector<8x8xf32>
    %232 = math.exp %231 : vector<8x8xf32>
    %cst_115 = arith.constant dense<0.000000e+00> : vector<8xf32>
    %233 = vector.multi_reduction <add>, %232, %cst_115 [1] : vector<8x8xf32> to vector<8xf32>
    %234 = vector.shape_cast %233 : vector<8xf32> to vector<8x1xf32>
    %235 = tpu.reciprocal %234 {approx = true} : vector<8x1xf32> -> vector<8x1xf32>
    %236 = vector.broadcast %235 : vector<8x1xf32> to vector<8x8xf32>
    %237 = arith.mulf %232, %236 : vector<8x8xf32>
    %cst_116 = arith.constant dense<0.000000e+00> : vector<8x8xf32>
    %238 = tpu.matmul %237, %226, %cst_116 {dimension_numbers = #tpu.dot_dimension_numbers<[1], [0], [0], [1], [0, 0, 1, 1], [], []>} : vector<8x8xf32>, vector<8x8xf32>, vector<8x8xf32> -> vector<8x8xf32>
    %239 = vector.extract_strided_slice %191 {offsets = [8, 0], sizes = [8, 32], strides = [1, 1]} : vector<32x32xf32> to vector<8x32xf32>
    %cst_117 = arith.constant dense<0.000000e+00> : vector<8x32xf32>
    %240 = tpu.matmul %238, %239, %cst_117 {dimension_numbers = #tpu.dot_dimension_numbers<[1], [0], [0], [1], [0, 0, 1, 1], [], []>} : vector<8x8xf32>, vector<8x32xf32>, vector<8x32xf32> -> vector<8x32xf32>
    %241 = arith.addf %223, %240 : vector<8x32xf32>
    %242 = vector.extract_strided_slice %200 {offsets = [0, 16], sizes = [8, 8], strides = [1, 1]} : vector<8x32xf32> to vector<8x8xf32>
    %243 = vector.extract_strided_slice %203 {offsets = [0, 16], sizes = [8, 8], strides = [1, 1]} : vector<8x32xf32> to vector<8x8xf32>
    %244 = vector.extract_strided_slice %206 {offsets = [0, 16], sizes = [8, 8], strides = [1, 1]} : vector<8x32xf32> to vector<8x8xf32>
    %cst_118 = arith.constant dense<0.000000e+00> : vector<8x8xf32>
    %245 = tpu.matmul %242, %243, %cst_118 {dimension_numbers = #tpu.dot_dimension_numbers<[1], [1], [0], [0], [0, 0, 1, 0], [], []>} : vector<8x8xf32>, vector<8x8xf32>, vector<8x8xf32> -> vector<8x8xf32>
    %cst_119 = arith.constant dense<0xFF800000> : vector<8xf32>
    %246 = vector.multi_reduction <maximumf>, %245, %cst_119 [1] : vector<8x8xf32> to vector<8xf32>
    %247 = vector.shape_cast %246 : vector<8xf32> to vector<8x1xf32>
    %248 = vector.broadcast %247 : vector<8x1xf32> to vector<8x8xf32>
    %249 = arith.subf %245, %248 : vector<8x8xf32>
    %250 = math.exp %249 : vector<8x8xf32>
    %cst_120 = arith.constant dense<0.000000e+00> : vector<8xf32>
    %251 = vector.multi_reduction <add>, %250, %cst_120 [1] : vector<8x8xf32> to vector<8xf32>
    %252 = vector.shape_cast %251 : vector<8xf32> to vector<8x1xf32>
    %253 = tpu.reciprocal %252 {approx = true} : vector<8x1xf32> -> vector<8x1xf32>
    %254 = vector.broadcast %253 : vector<8x1xf32> to vector<8x8xf32>
    %255 = arith.mulf %250, %254 : vector<8x8xf32>
    %cst_121 = arith.constant dense<0.000000e+00> : vector<8x8xf32>
    %256 = tpu.matmul %255, %244, %cst_121 {dimension_numbers = #tpu.dot_dimension_numbers<[1], [0], [0], [1], [0, 0, 1, 1], [], []>} : vector<8x8xf32>, vector<8x8xf32>, vector<8x8xf32> -> vector<8x8xf32>
    %257 = vector.extract_strided_slice %191 {offsets = [16, 0], sizes = [8, 32], strides = [1, 1]} : vector<32x32xf32> to vector<8x32xf32>
    %cst_122 = arith.constant dense<0.000000e+00> : vector<8x32xf32>
    %258 = tpu.matmul %256, %257, %cst_122 {dimension_numbers = #tpu.dot_dimension_numbers<[1], [0], [0], [1], [0, 0, 1, 1], [], []>} : vector<8x8xf32>, vector<8x32xf32>, vector<8x32xf32> -> vector<8x32xf32>
    %259 = arith.addf %241, %258 : vector<8x32xf32>
    %260 = vector.extract_strided_slice %200 {offsets = [0, 24], sizes = [8, 8], strides = [1, 1]} : vector<8x32xf32> to vector<8x8xf32>
    %261 = vector.extract_strided_slice %203 {offsets = [0, 24], sizes = [8, 8], strides = [1, 1]} : vector<8x32xf32> to vector<8x8xf32>
    %262 = vector.extract_strided_slice %206 {offsets = [0, 24], sizes = [8, 8], strides = [1, 1]} : vector<8x32xf32> to vector<8x8xf32>
    %cst_123 = arith.constant dense<0.000000e+00> : vector<8x8xf32>
    %263 = tpu.matmul %260, %261, %cst_123 {dimension_numbers = #tpu.dot_dimension_numbers<[1], [1], [0], [0], [0, 0, 1, 0], [], []>} : vector<8x8xf32>, vector<8x8xf32>, vector<8x8xf32> -> vector<8x8xf32>
    %cst_124 = arith.constant dense<0xFF800000> : vector<8xf32>
    %264 = vector.multi_reduction <maximumf>, %263, %cst_124 [1] : vector<8x8xf32> to vector<8xf32>
    %265 = vector.shape_cast %264 : vector<8xf32> to vector<8x1xf32>
    %266 = vector.broadcast %265 : vector<8x1xf32> to vector<8x8xf32>
    %267 = arith.subf %263, %266 : vector<8x8xf32>
    %268 = math.exp %267 : vector<8x8xf32>
    %cst_125 = arith.constant dense<0.000000e+00> : vector<8xf32>
    %269 = vector.multi_reduction <add>, %268, %cst_125 [1] : vector<8x8xf32> to vector<8xf32>
    %270 = vector.shape_cast %269 : vector<8xf32> to vector<8x1xf32>
    %271 = tpu.reciprocal %270 {approx = true} : vector<8x1xf32> -> vector<8x1xf32>
    %272 = vector.broadcast %271 : vector<8x1xf32> to vector<8x8xf32>
    %273 = arith.mulf %268, %272 : vector<8x8xf32>
    %cst_126 = arith.constant dense<0.000000e+00> : vector<8x8xf32>
    %274 = tpu.matmul %273, %262, %cst_126 {dimension_numbers = #tpu.dot_dimension_numbers<[1], [0], [0], [1], [0, 0, 1, 1], [], []>} : vector<8x8xf32>, vector<8x8xf32>, vector<8x8xf32> -> vector<8x8xf32>
    %275 = vector.extract_strided_slice %191 {offsets = [24, 0], sizes = [8, 32], strides = [1, 1]} : vector<32x32xf32> to vector<8x32xf32>
    %cst_127 = arith.constant dense<0.000000e+00> : vector<8x32xf32>
    %276 = tpu.matmul %274, %275, %cst_127 {dimension_numbers = #tpu.dot_dimension_numbers<[1], [0], [0], [1], [0, 0, 1, 1], [], []>} : vector<8x8xf32>, vector<8x32xf32>, vector<8x32xf32> -> vector<8x32xf32>
    %277 = arith.addf %259, %276 : vector<8x32xf32>
    %278 = vector.broadcast %195 : vector<1x32xf32> to vector<8x32xf32>
    %279 = arith.addf %277, %278 : vector<8x32xf32>
    %c0_128 = arith.constant 0 : index
    %c0_129 = arith.constant 0 : index
    %280 = vector.load %arg30[%c0_128, %c0_129] : memref<32x32xf32, #tpu.memory_space<vmem>>, vector<32x32xf32>
    %c0_130 = arith.constant 0 : index
    %c0_131 = arith.constant 0 : index
    %281 = vector.load %arg31[%c0_130, %c0_131] : memref<32x32xf32, #tpu.memory_space<vmem>>, vector<32x32xf32>
    %c0_132 = arith.constant 0 : index
    %c0_133 = arith.constant 0 : index
    %282 = vector.load %arg32[%c0_132, %c0_133] : memref<1x32xf32, #tpu.memory_space<vmem>>, vector<1x32xf32>
    %c0_134 = arith.constant 0 : index
    %c0_135 = arith.constant 0 : index
    %283 = vector.load %arg33[%c0_134, %c0_135] : memref<1x32xf32, #tpu.memory_space<vmem>>, vector<1x32xf32>
    %c0_136 = arith.constant 0 : index
    %c0_137 = arith.constant 0 : index
    %284 = vector.load %arg34[%c0_136, %c0_137] : memref<1x32xf32, #tpu.memory_space<vmem>>, vector<1x32xf32>
    %cst_138 = arith.constant dense<0.000000e+00> : vector<8x32xf32>
    %285 = tpu.matmul %47, %280, %cst_138 {dimension_numbers = #tpu.dot_dimension_numbers<[1], [0], [0], [1], [0, 0, 1, 1], [], []>} : vector<8x32xf32>, vector<32x32xf32>, vector<8x32xf32> -> vector<8x32xf32>
    %cst_139 = arith.constant dense<0.000000e+00> : vector<8x32xf32>
    %286 = tpu.matmul %187, %281, %cst_139 {dimension_numbers = #tpu.dot_dimension_numbers<[1], [0], [0], [1], [0, 0, 1, 1], [], []>} : vector<8x32xf32>, vector<32x32xf32>, vector<8x32xf32> -> vector<8x32xf32>
    %287 = arith.addf %285, %286 : vector<8x32xf32>
    %288 = vector.broadcast %282 : vector<1x32xf32> to vector<8x32xf32>
    %289 = arith.addf %287, %288 : vector<8x32xf32>
    %cst_140 = arith.constant dense<0.000000e+00> : vector<8xf32>
    %290 = vector.multi_reduction <add>, %289, %cst_140 [1] : vector<8x32xf32> to vector<8xf32>
    %291 = vector.shape_cast %290 : vector<8xf32> to vector<8x1xf32>
    %cst_141 = arith.constant 3.200000e+01 : f32
    %292 = vector.broadcast %cst_141 : f32 to vector<8x1xf32>
    %293 = arith.divf %291, %292 : vector<8x1xf32>
    %294 = vector.broadcast %293 : vector<8x1xf32> to vector<8x32xf32>
    %295 = arith.subf %289, %294 : vector<8x32xf32>
    %296 = arith.mulf %295, %295 : vector<8x32xf32>
    %cst_142 = arith.constant dense<0.000000e+00> : vector<8xf32>
    %297 = vector.multi_reduction <add>, %296, %cst_142 [1] : vector<8x32xf32> to vector<8xf32>
    %298 = vector.shape_cast %297 : vector<8xf32> to vector<8x1xf32>
    %cst_143 = arith.constant 3.200000e+01 : f32
    %299 = vector.broadcast %cst_143 : f32 to vector<8x1xf32>
    %300 = arith.divf %298, %299 : vector<8x1xf32>
    %301 = vector.broadcast %293 : vector<8x1xf32> to vector<8x32xf32>
    %302 = arith.subf %289, %301 : vector<8x32xf32>
    %cst_144 = arith.constant 9.99999974E-6 : f32
    %303 = vector.broadcast %cst_144 : f32 to vector<8x1xf32>
    %304 = arith.addf %300, %303 : vector<8x1xf32>
    %305 = math.rsqrt %304 : vector<8x1xf32>
    %306 = vector.broadcast %305 : vector<8x1xf32> to vector<8x32xf32>
    %307 = arith.mulf %302, %306 : vector<8x32xf32>
    %308 = vector.broadcast %283 : vector<1x32xf32> to vector<8x32xf32>
    %309 = arith.mulf %307, %308 : vector<8x32xf32>
    %310 = vector.broadcast %284 : vector<1x32xf32> to vector<8x32xf32>
    %311 = arith.addf %309, %310 : vector<8x32xf32>
    %312 = arith.mulf %311, %311 : vector<8x32xf32>
    %cst_145 = arith.constant dense<0.000000e+00> : vector<8xf32>
    %313 = vector.multi_reduction <add>, %312, %cst_145 [1] : vector<8x32xf32> to vector<8xf32>
    %314 = vector.shape_cast %313 : vector<8xf32> to vector<8x1xf32>
    %315 = math.sqrt %314 : vector<8x1xf32>
    %cst_146 = arith.constant 9.99999996E-13 : f32
    %316 = vector.broadcast %cst_146 : f32 to vector<8x1xf32>
    %317 = arith.maximumf %315, %316 : vector<8x1xf32>
    %318 = tpu.reciprocal %317 {approx = true} : vector<8x1xf32> -> vector<8x1xf32>
    %319 = vector.broadcast %318 : vector<8x1xf32> to vector<8x32xf32>
    %320 = arith.mulf %311, %319 : vector<8x32xf32>
    %c0_147 = arith.constant 0 : index
    %c0_148 = arith.constant 0 : index
    %321 = vector.load %arg35[%c0_147, %c0_148] : memref<32x32xf32, #tpu.memory_space<vmem>>, vector<32x32xf32>
    %c0_149 = arith.constant 0 : index
    %c0_150 = arith.constant 0 : index
    %322 = vector.load %arg36[%c0_149, %c0_150] : memref<32x32xf32, #tpu.memory_space<vmem>>, vector<32x32xf32>
    %c0_151 = arith.constant 0 : index
    %c0_152 = arith.constant 0 : index
    %323 = vector.load %arg37[%c0_151, %c0_152] : memref<1x32xf32, #tpu.memory_space<vmem>>, vector<1x32xf32>
    %c0_153 = arith.constant 0 : index
    %c0_154 = arith.constant 0 : index
    %324 = vector.load %arg38[%c0_153, %c0_154] : memref<1x32xf32, #tpu.memory_space<vmem>>, vector<1x32xf32>
    %c0_155 = arith.constant 0 : index
    %c0_156 = arith.constant 0 : index
    %325 = vector.load %arg39[%c0_155, %c0_156] : memref<1x32xf32, #tpu.memory_space<vmem>>, vector<1x32xf32>
    %cst_157 = arith.constant dense<0.000000e+00> : vector<8x32xf32>
    %326 = tpu.matmul %95, %321, %cst_157 {dimension_numbers = #tpu.dot_dimension_numbers<[1], [0], [0], [1], [0, 0, 1, 1], [], []>} : vector<8x32xf32>, vector<32x32xf32>, vector<8x32xf32> -> vector<8x32xf32>
    %cst_158 = arith.constant dense<0.000000e+00> : vector<8x32xf32>
    %327 = tpu.matmul %279, %322, %cst_158 {dimension_numbers = #tpu.dot_dimension_numbers<[1], [0], [0], [1], [0, 0, 1, 1], [], []>} : vector<8x32xf32>, vector<32x32xf32>, vector<8x32xf32> -> vector<8x32xf32>
    %328 = arith.addf %326, %327 : vector<8x32xf32>
    %329 = vector.broadcast %323 : vector<1x32xf32> to vector<8x32xf32>
    %330 = arith.addf %328, %329 : vector<8x32xf32>
    %cst_159 = arith.constant dense<0.000000e+00> : vector<8xf32>
    %331 = vector.multi_reduction <add>, %330, %cst_159 [1] : vector<8x32xf32> to vector<8xf32>
    %332 = vector.shape_cast %331 : vector<8xf32> to vector<8x1xf32>
    %cst_160 = arith.constant 3.200000e+01 : f32
    %333 = vector.broadcast %cst_160 : f32 to vector<8x1xf32>
    %334 = arith.divf %332, %333 : vector<8x1xf32>
    %335 = vector.broadcast %334 : vector<8x1xf32> to vector<8x32xf32>
    %336 = arith.subf %330, %335 : vector<8x32xf32>
    %337 = arith.mulf %336, %336 : vector<8x32xf32>
    %cst_161 = arith.constant dense<0.000000e+00> : vector<8xf32>
    %338 = vector.multi_reduction <add>, %337, %cst_161 [1] : vector<8x32xf32> to vector<8xf32>
    %339 = vector.shape_cast %338 : vector<8xf32> to vector<8x1xf32>
    %cst_162 = arith.constant 3.200000e+01 : f32
    %340 = vector.broadcast %cst_162 : f32 to vector<8x1xf32>
    %341 = arith.divf %339, %340 : vector<8x1xf32>
    %342 = vector.broadcast %334 : vector<8x1xf32> to vector<8x32xf32>
    %343 = arith.subf %330, %342 : vector<8x32xf32>
    %cst_163 = arith.constant 9.99999974E-6 : f32
    %344 = vector.broadcast %cst_163 : f32 to vector<8x1xf32>
    %345 = arith.addf %341, %344 : vector<8x1xf32>
    %346 = math.rsqrt %345 : vector<8x1xf32>
    %347 = vector.broadcast %346 : vector<8x1xf32> to vector<8x32xf32>
    %348 = arith.mulf %343, %347 : vector<8x32xf32>
    %349 = vector.broadcast %324 : vector<1x32xf32> to vector<8x32xf32>
    %350 = arith.mulf %348, %349 : vector<8x32xf32>
    %351 = vector.broadcast %325 : vector<1x32xf32> to vector<8x32xf32>
    %352 = arith.addf %350, %351 : vector<8x32xf32>
    %353 = arith.mulf %352, %352 : vector<8x32xf32>
    %cst_164 = arith.constant dense<0.000000e+00> : vector<8xf32>
    %354 = vector.multi_reduction <add>, %353, %cst_164 [1] : vector<8x32xf32> to vector<8xf32>
    %355 = vector.shape_cast %354 : vector<8xf32> to vector<8x1xf32>
    %356 = math.sqrt %355 : vector<8x1xf32>
    %cst_165 = arith.constant 9.99999996E-13 : f32
    %357 = vector.broadcast %cst_165 : f32 to vector<8x1xf32>
    %358 = arith.maximumf %356, %357 : vector<8x1xf32>
    %359 = tpu.reciprocal %358 {approx = true} : vector<8x1xf32> -> vector<8x1xf32>
    %360 = vector.broadcast %359 : vector<8x1xf32> to vector<8x32xf32>
    %361 = arith.mulf %352, %360 : vector<8x32xf32>
    %c0_166 = arith.constant 0 : index
    %c0_167 = arith.constant 0 : index
    %362 = vector.load %arg40[%c0_166, %c0_167] : memref<32x6xf32, #tpu.memory_space<vmem>>, vector<32x6xf32>
    %cst_168 = arith.constant dense<0.000000e+00> : vector<8x6xf32>
    %363 = tpu.matmul %311, %362, %cst_168 {dimension_numbers = #tpu.dot_dimension_numbers<[1], [0], [0], [1], [0, 0, 1, 1], [], []>} : vector<8x32xf32>, vector<32x6xf32>, vector<8x6xf32> -> vector<8x6xf32>
    %c0_169 = arith.constant 0 : index
    %c0_170 = arith.constant 0 : index
    %364 = vector.load %arg41[%c0_169, %c0_170] : memref<1x6xf32, #tpu.memory_space<vmem>>, vector<1x6xf32>
    %365 = vector.broadcast %364 : vector<1x6xf32> to vector<8x6xf32>
    %366 = arith.addf %363, %365 : vector<8x6xf32>
    %c0_171 = arith.constant 0 : index
    %c0_172 = arith.constant 0 : index
    %367 = vector.load %arg42[%c0_171, %c0_172] : memref<32x6xf32, #tpu.memory_space<vmem>>, vector<32x6xf32>
    %cst_173 = arith.constant dense<0.000000e+00> : vector<8x6xf32>
    %368 = tpu.matmul %352, %367, %cst_173 {dimension_numbers = #tpu.dot_dimension_numbers<[1], [0], [0], [1], [0, 0, 1, 1], [], []>} : vector<8x32xf32>, vector<32x6xf32>, vector<8x6xf32> -> vector<8x6xf32>
    %c0_174 = arith.constant 0 : index
    %c0_175 = arith.constant 0 : index
    %369 = vector.load %arg43[%c0_174, %c0_175] : memref<1x6xf32, #tpu.memory_space<vmem>>, vector<1x6xf32>
    %370 = vector.broadcast %369 : vector<1x6xf32> to vector<8x6xf32>
    %371 = arith.addf %368, %370 : vector<8x6xf32>
    %c0_176 = arith.constant 0 : index
    %c0_177 = arith.constant 0 : index
    %372 = vector.load %arg44[%c0_176, %c0_177] : memref<32x6xf32, #tpu.memory_space<vmem>>, vector<32x6xf32>
    %cst_178 = arith.constant dense<0.000000e+00> : vector<8x6xf32>
    %373 = tpu.matmul %311, %372, %cst_178 {dimension_numbers = #tpu.dot_dimension_numbers<[1], [0], [0], [1], [0, 0, 1, 1], [], []>} : vector<8x32xf32>, vector<32x6xf32>, vector<8x6xf32> -> vector<8x6xf32>
    %c0_179 = arith.constant 0 : index
    %c0_180 = arith.constant 0 : index
    %374 = vector.load %arg45[%c0_179, %c0_180] : memref<32x6xf32, #tpu.memory_space<vmem>>, vector<32x6xf32>
    %cst_181 = arith.constant dense<0.000000e+00> : vector<8x6xf32>
    %375 = tpu.matmul %352, %374, %cst_181 {dimension_numbers = #tpu.dot_dimension_numbers<[1], [0], [0], [1], [0, 0, 1, 1], [], []>} : vector<8x32xf32>, vector<32x6xf32>, vector<8x6xf32> -> vector<8x6xf32>
    %376 = arith.addf %373, %375 : vector<8x6xf32>
    %c0_182 = arith.constant 0 : index
    %c0_183 = arith.constant 0 : index
    %377 = vector.load %arg46[%c0_182, %c0_183] : memref<1x6xf32, #tpu.memory_space<vmem>>, vector<1x6xf32>
    %378 = vector.broadcast %377 : vector<1x6xf32> to vector<8x6xf32>
    %379 = arith.addf %376, %378 : vector<8x6xf32>
    %cst_184 = arith.constant 0.000000e+00 : f32
    %380 = vector.broadcast %cst_184 : f32 to vector<8x256xf32>
    %c0_185 = arith.constant 0 : index
    %c0_186 = arith.constant 0 : index
    %381 = vector.load %arg47[%c0_185, %c0_186] : memref<8x256xf32, #tpu.memory_space<vmem>>, vector<8x256xf32>
    tpu.vector_store %arg47[%c0_185, %c0_186], %380 {strides = array<i32>} : memref<8x256xf32, #tpu.memory_space<vmem>>, vector<8x256xf32>,
    %c0_187 = arith.constant 0 : index
    %c0_188 = arith.constant 0 : index
    %382 = vector.load %arg47[%c0_187, %c0_188] : memref<8x256xf32, #tpu.memory_space<vmem>>, vector<8x32xf32>
    tpu.vector_store %arg47[%c0_187, %c0_188], %311 {strides = array<i32>} : memref<8x256xf32, #tpu.memory_space<vmem>>, vector<8x32xf32>,
    %c0_189 = arith.constant 0 : index
    %c32 = arith.constant 32 : index
    %383 = vector.load %arg47[%c0_189, %c32] : memref<8x256xf32, #tpu.memory_space<vmem>>, vector<8x32xf32>
    tpu.vector_store %arg47[%c0_189, %c32], %352 {strides = array<i32>} : memref<8x256xf32, #tpu.memory_space<vmem>>, vector<8x32xf32>,
    %c0_190 = arith.constant 0 : index
    %c64 = arith.constant 64 : index
    %384 = vector.load %arg47[%c0_190, %c64] : memref<8x256xf32, #tpu.memory_space<vmem>>, vector<8x32xf32>
    tpu.vector_store %arg47[%c0_190, %c64], %320 {strides = array<i32>} : memref<8x256xf32, #tpu.memory_space<vmem>>, vector<8x32xf32>,
    %c0_191 = arith.constant 0 : index
    %c96 = arith.constant 96 : index
    %385 = vector.load %arg47[%c0_191, %c96] : memref<8x256xf32, #tpu.memory_space<vmem>>, vector<8x32xf32>
    tpu.vector_store %arg47[%c0_191, %c96], %361 {strides = array<i32>} : memref<8x256xf32, #tpu.memory_space<vmem>>, vector<8x32xf32>,
    %c0_192 = arith.constant 0 : index
    %c128 = arith.constant 128 : index
    %386 = vector.load %arg47[%c0_192, %c128] : memref<8x256xf32, #tpu.memory_space<vmem>>, vector<8x6xf32>
    tpu.vector_store %arg47[%c0_192, %c128], %366 {strides = array<i32>} : memref<8x256xf32, #tpu.memory_space<vmem>>, vector<8x6xf32>,
    %c0_193 = arith.constant 0 : index
    %c134 = arith.constant 134 : index
    %387 = vector.load %arg47[%c0_193, %c134] : memref<8x256xf32, #tpu.memory_space<vmem>>, vector<8x6xf32>
    tpu.vector_store %arg47[%c0_193, %c134], %371 {strides = array<i32>} : memref<8x256xf32, #tpu.memory_space<vmem>>, vector<8x6xf32>,
    %c0_194 = arith.constant 0 : index
    %c140 = arith.constant 140 : index
    %388 = vector.load %arg47[%c0_194, %c140] : memref<8x256xf32, #tpu.memory_space<vmem>>, vector<8x6xf32>
    tpu.vector_store %arg47[%c0_194, %c140], %379 {strides = array<i32>} : memref<8x256xf32, #tpu.memory_space<vmem>>, vector<8x6xf32>,
    return
  }
}

</mosaic_0001>

<bundles_post_ra>
// kernel: enhanced_multimodal_aligner_forward.1
= control target key start
LH: loop header
LB: loop body
LE: loop exit
PB: predicated region body
PF: predicated region fallthrough
CT: control target
= control target key end

     0   :  { %s4748_s6 = smov 1   ;;  %s4749_s10 = smov 2   ;;  %s5509_s0 = inlined_call_operand.smem [shape: u32[48], index: -1, kind: input, shape index: {}] }
   0x1   :  { %s4816_s5 = sld [smem:[%s5509_s0]]   ;;  %s4750_s14 = smov 3  }
   0x2   :  { %s4821_s9 = sld [smem:[%s5509_s0 + %s4748_s6]]   ;;  %s4751_s18 = smov 4  }
   0x3   :  { %s4826_s13 = sld [smem:[%s5509_s0 + %s4749_s10]]   ;;  %s4752_s22 = smov 5  }
   0x4   :  { %s4831_s17 = sld [smem:[%s5509_s0 + %s4750_s14]]   ;;  %s4753_s26 = smov 6  }
   0x5   :  { %s4836_s21 = sld [smem:[%s5509_s0 + %s4751_s18]]   ;;  %s4754_s30 = smov 7  }
   0x6   :  { %s4841_s25 = sld [smem:[%s5509_s0 + %s4752_s22]]   ;;  %s4755_s4 = smov 8  }
   0x7   :  { %s4846_s29 = sld [smem:[%s5509_s0 + %s4753_s26]]   ;;  %s4756_s10 = smov 9  }
   0x8   :  { %s4851_s3 = sld [smem:[%s5509_s0 + %s4754_s30]]   ;;  %s4757_s15 = smov 10  }
   0x9   :  { %s4856_s8 = sld [smem:[%s5509_s0 + %s4755_s4]]   ;;  %s4758_s20 = smov 11  }
   0xa   :  { %s4861_s14 = sld [smem:[%s5509_s0 + %s4756_s10]]   ;;  %s4759_s26 = smov 12  }
   0xb   :  { %s4866_s19 = sld [smem:[%s5509_s0 + %s4757_s15]]   ;;  %s4760_s1 = smov 13  }
   0xc   :  { %s4871_s24 = sld [smem:[%s5509_s0 + %s4758_s20]]   ;;  %s4761_s7 = smov 14  }
   0xd   :  { %s4876_s30 = sld [smem:[%s5509_s0 + %s4759_s26]]   ;;  %s4762_s15 = smov 15  }
   0xe   :  { %5523 = sst [smem:[#allocation8_spill]] %s4851_s3  ;;  %s4763_s22 = smov 16  }
   0xf   :  { %s4881_s6 = sld [smem:[%s5509_s0 + %s4760_s1]]   ;;  %s4764_s28 = smov 17  }
  0x10   :  { %s4886_s12 = sld [smem:[%s5509_s0 + %s4761_s7]]   ;;  %s4765_s7 = smov 18  }
  0x11   :  { %s4891_s20 = sld [smem:[%s5509_s0 + %s4762_s15]]   ;;  %s4766_s15 = smov 19  }
  0x12   :  { %s4896_s27 = sld [smem:[%s5509_s0 + %s4763_s22]]   ;;  %s4767_s22 = smov 20  }
  0x13   :  { %s4901_s4 = sld [smem:[%s5509_s0 + %s4764_s28]]   ;;  %s4768_s28 = smov 21  }
  0x14   :  { %s4911_s3 = sld [smem:[%s5509_s0 + %s4766_s15]]   ;;  %s4770_s15 = smov 23  }
  0x15   :  { %5524 = sst [smem:[#allocation9_spill]] %s4881_s6 }
  0x16   :  { %s4906_s6 = sld [smem:[%s5509_s0 + %s4765_s7]]   ;;  %s4769_s7 = smov 22  }
  0x17   :  { %5525 = sst [smem:[#allocation10_spill]] %s4891_s20 }
  0x18   :  { %5526 = sst [smem:[#allocation11_spill]] %s4896_s27 }
  0x19   :  { %5527 = sst [smem:[#allocation12_spill]] %s4901_s4 }
  0x1a   :  { %5529 = sst [smem:[#allocation14_spill]] %s4911_s3 }
  0x1b   :  { %s4916_s27 = sld [smem:[%s5509_s0 + %s4767_s22]]   ;;  %s4771_s22 = smov 24  }
  0x1c   :  { %5528 = sst [smem:[#allocation13_spill]] %s4906_s6 }
  0x1d   :  { %s4921_s4 = sld [smem:[%s5509_s0 + %s4768_s28]]   ;;  %s4772_s28 = smov 25  }
  0x1e   :  { %s4926_s6 = sld [smem:[%s5509_s0 + %s4769_s7]]   ;;  %s4773_s7 = smov 26  }
  0x1f   :  { %s4931_s3 = sld [smem:[%s5509_s0 + %s4770_s15]]   ;;  %s4774_s15 = smov 27  }
  0x21   :  { %5530 = sst [smem:[#allocation15_spill]] %s4916_s27 }
  0x22   :  { %s4936_s27 = sld [smem:[%s5509_s0 + %s4771_s22]]   ;;  %s4775_s22 = smov 28  }
  0x23   :  { %5531 = sst [smem:[#allocation16_spill]] %s4921_s4 }
  0x24   :  { %5532 = sst [smem:[#allocation17_spill]] %s4926_s6 }
  0x25   :  { %5533 = sst [smem:[#allocation18_spill]] %s4931_s3 }
  0x26   :  { %s4941_s4 = sld [smem:[%s5509_s0 + %s4772_s28]]   ;;  %s4776_s28 = smov 29  }
  0x27   :  { %s4946_s6 = sld [smem:[%s5509_s0 + %s4773_s7]]   ;;  %s4777_s7 = smov 30  }
  0x28   :  { %5534 = sst [smem:[#allocation19_spill]] %s4936_s27 }
  0x29   :  { %s4951_s3 = sld [smem:[%s5509_s0 + %s4774_s15]]   ;;  %s4778_s15 = smov 31  }
  0x2a   :  { %s4956_s27 = sld [smem:[%s5509_s0 + %s4775_s22]]   ;;  %s4779_s22 = smov 32  }
  0x2c   :  { %5535 = sst [smem:[#allocation20_spill]] %s4941_s4 }
  0x2d   :  { %5536 = sst [smem:[#allocation21_spill]] %s4946_s6 }
  0x2e   :  { %s4961_s4 = sld [smem:[%s5509_s0 + %s4776_s28]]   ;;  %s4780_s28 = smov 33  }
  0x2f   :  { %5537 = sst [smem:[#allocation22_spill]] %s4951_s3 }
  0x30   :  { %5538 = sst [smem:[#allocation23_spill]] %s4956_s27 }
  0x31   :  { %s4966_s6 = sld [smem:[%s5509_s0 + %s4777_s7]]   ;;  %s4781_s7 = smov 34  }
  0x32   :  { %s4971_s3 = sld [smem:[%s5509_s0 + %s4778_s15]]   ;;  %s4782_s15 = smov 35  }
  0x33   :  { %s4976_s27 = sld [smem:[%s5509_s0 + %s4779_s22]]   ;;  %s4783_s22 = smov 36  }
  0x34   :  { %5539 = sst [smem:[#allocation24_spill]] %s4961_s4 }
  0x35   :  { %s4981_s4 = sld [smem:[%s5509_s0 + %s4780_s28]]   ;;  %s4784_s28 = smov 37  }
  0x37   :  { %5540 = sst [smem:[#allocation25_spill]] %s4966_s6 }
  0x38   :  { %5541 = sst [smem:[#allocation26_spill]] %s4971_s3 }
  0x39   :  { %5542 = sst [smem:[#allocation27_spill]] %s4976_s27 }
  0x3a   :  { %s4986_s6 = sld [smem:[%s5509_s0 + %s4781_s7]]   ;;  %s4785_s7 = smov 38  }
  0x3b   :  { %5543 = sst [smem:[#allocation28_spill]] %s4981_s4 }
  0x3c   :  { %s4991_s3 = sld [smem:[%s5509_s0 + %s4782_s15]]   ;;  %s4786_s15 = smov 39  }
  0x3d   :  { %s4996_s27 = sld [smem:[%s5509_s0 + %s4783_s22]]   ;;  %s4787_s22 = smov 40  }
  0x3e   :  { %s5001_s4 = sld [smem:[%s5509_s0 + %s4784_s28]]   ;;  %s4788_s28 = smov 41  }
  0x40   :  { %5544 = sst [smem:[#allocation29_spill]] %s4986_s6 }
  0x41   :  { %s5006_s6 = sld [smem:[%s5509_s0 + %s4785_s7]]   ;;  %s4789_s7 = smov 42  }
  0x42   :  { %5545 = sst [smem:[#allocation30_spill]] %s4991_s3 }
  0x43   :  { %5546 = sst [smem:[#allocation31_spill]] %s4996_s27 }
  0x44   :  { %5547 = sst [smem:[#allocation32_spill]] %s5001_s4 }
  0x45   :  { %s5011_s3 = sld [smem:[%s5509_s0 + %s4786_s15]]   ;;  %s4790_s15 = smov 43  }
  0x46   :  { %s5016_s27 = sld [smem:[%s5509_s0 + %s4787_s22]]   ;;  %s4791_s22 = smov 44  }
  0x47   :  { %5548 = sst [smem:[#allocation33_spill]] %s5006_s6 }
  0x48   :  { %s5021_s4 = sld [smem:[%s5509_s0 + %s4788_s28]]   ;;  %s4792_s28 = smov 45  }
  0x49   :  { %s5026_s6 = sld [smem:[%s5509_s0 + %s4789_s7]]   ;;  %s4793_s7 = smov 46  }
  0x4b   :  { %5549 = sst [smem:[#allocation34_spill]] %s5011_s3 }
  0x4c   :  { %5550 = sst [smem:[#allocation35_spill]] %s5016_s27 }
  0x4d   :  { %s5031_s3 = sld [smem:[%s5509_s0 + %s4790_s15]]   ;;  %s4794_s15 = smov 47  }
  0x4e   :  { %5551 = sst [smem:[#allocation36_spill]] %s5021_s4 }
  0x4f   :  { %5552 = sst [smem:[#allocation37_spill]] %s5026_s6 }
  0x50   :  { %s5036_s27 = sld [smem:[%s5509_s0 + %s4791_s22]]  }
  0x51   :  { %s5041_s4 = sld [smem:[%s5509_s0 + %s4792_s28]]  }
  0x52   :  { %s5046_s6 = sld [smem:[%s5509_s0 + %s4793_s7]]  }
  0x53   :  { %s5051_s20 = sld [smem:[%s5509_s0 + %s4794_s15]]  }
  0x54   :  { %100 = vsyncpa [#allocation3], 0 }
  0x55   :  { %101 = vsyncpa [#allocation5], 0  ;;  %s4795_s22 = smov [#allocation2]   ;;  %s4796_s26 = smov [#allocation4]  }
  0x56   :  { %s194_s23 = sshll.u32 %s4795_s22, 4  ;;  %s208_s28 = sshll.u32 %s4796_s26, 4  ;;  %s195_s23 = int_to_ptr.vmem [resolvable:$true] %s194_s23  ;;  %s209_s28 = int_to_ptr.vmem [resolvable:$true] %s208_s28 }
  0x57   :  { %s4700_s1 = scalar_lea.hbm %s5031_s3, 16 }
  0x58   :  { %p4701_p0 = scmp.ne.s32.totalorder %s5031_s3, %s4700_s1  ;;  %p4704_p1 = scmp.lt.u32.totalorder %s4700_s1, %s5031_s3 }
  0x5a   :  { %p4706_p2 = pnand %p4704_p1, %p4701_p0 }
  0x5c   :  { %4709 = shalt.err (!%p4706_p2)
}
  0x5d   :  { %s4710_s2 = scalar_lea.vmem %s195_s23, 16  ;;  %s4714_s0 = scalar_lea.vmem %s195_s23, 32 }
  0x5e   :  { %p4711_p3 = scmp.ne.s32.totalorder %s195_s23, %s4710_s2  ;;  %p4715_p4 = scmp.lt.s32.totalorder %s195_s23, %s195_s23 }
  0x5f   :  { %p4716_p5 = scmp.lt.s32.totalorder %s4714_s0, %s4710_s2 }
  0x61   :  { %p4717_p6 = por %p4716_p5, %p4715_p4 }
  0x63   :  { %p4718_p7 = pnand %p4717_p6, %p4711_p3 }
  0x65   :  { %4721 = shalt.err (!%p4718_p7)
}
  0x66   :  { %197 = dma.hbm_to_vmem [thread:$0]  %s5031_s3, 16, %s195_s23, [#allocation3]  }
  0x67   :  { %s4722_s7 = scalar_lea.hbm %s5046_s6, 16 }
  0x68   :  { %p4723_p8 = scmp.ne.s32.totalorder %s5046_s6, %s4722_s7  ;;  %p4726_p9 = scmp.lt.u32.totalorder %s4722_s7, %s5046_s6 }
  0x6a   :  { %p4728_p10 = pnand %p4726_p9, %p4723_p8 }
  0x6c   :  { %4731 = shalt.err (!%p4728_p10)
}
  0x6d   :  { %s4732_s10 = scalar_lea.vmem %s209_s28, 16  ;;  %s4736_s11 = scalar_lea.vmem %s209_s28, 32 }
  0x6e   :  { %p4733_p11 = scmp.ne.s32.totalorder %s209_s28, %s4732_s10  ;;  %p4737_p12 = scmp.lt.s32.totalorder %s209_s28, %s209_s28 }
  0x6f   :  { %p4738_p13 = scmp.lt.s32.totalorder %s4736_s11, %s4732_s10 }
  0x71   :  { %p4739_p0 = por %p4738_p13, %p4737_p12 }
  0x73   :  { %p4740_p1 = pnand %p4739_p0, %p4733_p11 }
  0x75   :  { %4743 = shalt.err (!%p4740_p1)
}
  0x76   :  { %211 = dma.hbm_to_vmem [thread:$0]  %s5046_s6, 16, %s209_s28, [#allocation5]  }
  0x77   :  { %4744 = dma.done.wait [#allocation3], 16  }
  0x78   :  { %4745 = vsyncadd [#allocation3], 4294967280 }
  0x79   :  { %4746 = dma.done.wait [#allocation5], 16  }
  0x7a   :  { %4747 = vsyncadd [#allocation5], 4294967280  ;;  %v4797_v0 = vmov 0.0|0.0   ;;  %vm4798_vm0 = vmmov 0   ;;  %v4799_v1 = vmov 0.0   ;;  %v219_v2 = vld [vmem:[%s4826_s13] sm:$0xff] }
  0x7b   :  { %4458 = vmatprep.subr.bf16.mxu0 %v4797_v0  ;;  %4124 = vmatprep.mubr.msk.f32.mxu0 %vm4798_vm0, %v4799_v1  ;;  %3798 = vst [vmem:[%s5051_s20] sm:$0xff] %v4799_v1  ;;  %3799 = vst [vmem:[%s5051_s20 + $0x8] sm:$0xff] %v4799_v1  ;;  %v220_v3 = vld [vmem:[%s4826_s13 + $0x8] sm:$0xff]  ;;  %v221_v4 = vld [vmem:[%s4826_s13 + $0x10] sm:$0xff]  ;;  %vm243_vm1 = vcmask 392192   ;;  %vm317_vm2 = vcmask 523264   ;;  %vm675_vm3 = vcmask 261120  }
  0x7c   :  { %4467 = vmatprep.subr.bf16.mxu1 %v4797_v0  ;;  %4143 = vmatprep.mubr.msk.f32.mxu1 %vm4798_vm0, %v4799_v1  ;;  %v4459_v5 = vpack.c.bf16 %v220_v3, %v219_v2  ;;  %v222_v6 = vld [vmem:[%s4826_s13 + $0x18] sm:$0xff]  ;;  %v223_v8 = vld [vmem:[%s4826_s13 + $0x20] sm:$0xff]  ;;  %v224_v9 = vld [vmem:[%s4826_s13 + $0x28] sm:$0xff]  ;;  %s5555_s13 = sld [smem:[#allocation8_spill]]  ;;  %s4800_s3 = smov 120   ;;  %vm905_vm4 = vcmask 64512  }
  0x7d   :  { %v4462_v7 = vpack.c.bf16 %v222_v6, %v221_v4  ;;  %v4465_v10 = vpack.c.bf16 %v224_v9, %v223_v8  ;;  %v435_v11 = vld [vmem:[%s4856_s8] sm:$0xff]  ;;  %v436_v12 = vld [vmem:[%s4856_s8 + $0x8] sm:$0xff]  ;;  %v437_v15 = vld [vmem:[%s4856_s8 + $0x10] sm:$0xff]  ;;  %s5563_s6 = sld [smem:[#allocation18_spill]]  ;;  %s5565_s15 = sld [smem:[#allocation22_spill]]  ;;  %vm3818_vm7 = vcmask 48128  }
  0x7e   :  { %4460 = vmatpush3.bf16.msra.mxu0 %v4459_v5  ;;  %v218_v13 = vld [vmem:[%s4816_s5] sm:$0xff]  ;;  %v4480_v14 = vpack.c.bf16 %v436_v12, %v435_v11  ;;  %v438_v16 = vld [vmem:[%s4856_s8 + $0x18] sm:$0xff]  ;;  %v440_v19 = vld [vmem:[%s4856_s8 + $0x28] sm:$0xff]  ;;  %s5553_s5 = sld [smem:[#allocation10_spill]]  ;;  %s5566_s16 = sld [smem:[#allocation23_spill]]  ;;  %vm3804_vm8 = vcmask 523520  }
  0x7f   :  { %4461 = vmatprep.subr.bf16.mxu0 %v4797_v0  ;;  %v4483_v17 = vpack.c.bf16 %v438_v16, %v437_v15  ;;  %v439_v18 = vld [vmem:[%s4856_s8 + $0x20] sm:$0xff]  ;;  %v441_v21 = vld [vmem:[%s4856_s8 + $0x30] sm:$0xff]  ;;  %v442_v22 = vld [vmem:[%s4856_s8 + $0x38] sm:$0xff]  ;;  %s5560_s8 = sld [smem:[#allocation12_spill]]  ;;  %s5568_s22 = sld [smem:[#allocation26_spill]]  ;;  %vm3810_vm9 = vcmask 785920  }
  0x80   :  { %v4486_v20 = vpack.c.bf16 %v440_v19, %v439_v18  ;;  %v4489_v23 = vpack.c.bf16 %v442_v22, %v441_v21  ;;  %v434_v24 = vld [vmem:[%s4821_s9] sm:$0xff]  ;;  %v229_v46 = vld [vmem:[%s4846_s29 + $0x8] sm:$0xff]  ;;  %v230_v48 = vld [vmem:[%s4846_s29 + $0x10] sm:$0xff]  ;;  %s5554_s9 = sld [smem:[#allocation11_spill]]  ;;  %s5567_s18 = sld [smem:[#allocation20_spill]]  ;;  %vm3824_vm12 = vcmask 97328  }
  0x81   :  { %v3885_v25 = vld [vmem:[%s4831_s17] ss:$0 sm:$0xff]  ;;  %v231_v49 = vld [vmem:[%s4846_s29 + $0x18] sm:$0xff]  ;;  %v233_v52 = vld [vmem:[%s4846_s29 + $0x28] sm:$0xff]  ;;  %s5556_s17 = sld [smem:[#allocation9_spill]]  ;;  %s5569_s23 = sld [smem:[#allocation16_spill]] }
  0x82   :  { %4463 = vmatpush3.bf16.msra.mxu0 %v4462_v7  ;;  %v3891_v30 = vld [vmem:[%s4861_s14] ss:$0 sm:$0xff]  ;;  %v4471_v50 = vpack.c.bf16 %v231_v49, %v230_v48  ;;  %v234_v54 = vld [vmem:[%s4846_s29 + $0x30] sm:$0xff]  ;;  %v235_v55 = vld [vmem:[%s4846_s29 + $0x38] sm:$0xff]  ;;  %s4801_s14 = smov 112   ;;  %s5570_s26 = sld [smem:[#allocation31_spill]] }
  0x83   :  { %4464 = vmatprep.subr.bf16.mxu0 %v4797_v0  ;;  %v228_v45 = vld [vmem:[%s4846_s29] sm:$0xff]  ;;  %v4477_v56 = vpack.c.bf16 %v235_v55, %v234_v54  ;;  %v650_v58 = vld [vmem:[%s4886_s12 + $0x8] sm:$0xff]  ;;  %s5571_s28 = sld [smem:[#allocation25_spill]]  ;;  %s5572_s1 = sld [smem:[#allocation30_spill]]  ;;  %vm3816_vm13 = vcmask 1048320   ;;  %vm3830_vm14 = vcmask 146528  }
  0x84   :  { %v4468_v47 = vpack.c.bf16 %v229_v46, %v228_v45  ;;  %v232_v51 = vld [vmem:[%s4846_s29 + $0x20] sm:$0xff]  ;;  %v651_v46 = vld [vmem:[%s4886_s12 + $0x10] sm:$0xff]  ;;  %s5559_s29 = sld [smem:[#allocation15_spill]]  ;;  %s5573_s2 = sld [smem:[#allocation24_spill]] }
  0x85   :  { %v4474_v53 = vpack.c.bf16 %v233_v52, %v232_v51  ;;  %v649_v57 = vld [vmem:[%s4886_s12] sm:$0xff]  ;;  %v655_v52 = vld [vmem:[%s5553_s5 + $0x10] sm:$0xff]  ;;  %s5574_s0 = sld [smem:[#allocation27_spill]]  ;;  %s5575_s7 = sld [smem:[#allocation32_spill]] }
  0x86   :  { %4466 = vmatpush3.bf16.msra.mxu0 %v4465_v10  ;;  %4469 = vmatpush3.bf16.msra.mxu1 %v4468_v47  ;;  %v4504_v59 = vpack.c.bf16 %v650_v58, %v649_v57  ;;  %v3887_v2 = vld [vmem:[%s4836_s21] ss:$0 sm:$0xff]  ;;  %v652_v47 = vld [vmem:[%s4886_s12 + $0x18] sm:$0xff]  ;;  %s5557_s21 = sld [smem:[#allocation13_spill]]  ;;  %s5576_s10 = sld [smem:[#allocation35_spill]] }
  0x87   :  { %4479 = vmatprep.subr.bf16.mxu0 %v4797_v0  ;;  %4470 = vmatprep.subr.bf16.mxu1 %v4797_v0  ;;  %v3888_v6 = vld [vmem:[%s4841_s25] ss:$0 sm:$0xff]  ;;  %v4507_v48 = vpack.c.bf16 %v652_v47, %v651_v46  ;;  %s5558_s25 = sld [smem:[#allocation14_spill]]  ;;  %s5564_s12 = sld [smem:[#allocation21_spill]] }
  0x88   :  { %v3893_v16 = vld [vmem:[%s4866_s19] ss:$0 sm:$0xff]  ;;  %s4802_s19 = smov 104   ;;  %s5577_s11 = sld [smem:[#allocation28_spill]] }
  0x89   :  { %4125 = vmatmul.mubr.msk.f32.vlgmr.msra.gmra.mrb[0].mxu0 %vm243_vm1, %v218_v13  ;;  %v3894_v18 = vld [vmem:[%s4871_s24] ss:$0 sm:$0xff]  ;;  %s5561_s24 = sld [smem:[#allocation17_spill]] }
  0x8a   :  { %4481 = vmatpush3.bf16.msra.mxu0 %v4480_v14  ;;  %4162 = vmatprep.mubr.msk.f32.mxu0 %vm4798_vm0, %v4799_v1  ;;  %v653_v49 = vld [vmem:[%s5553_s5] sm:$0xff] }
  0x8b   :  { %4482 = vmatprep.subr.bf16.mxu0 %v4797_v0  ;;  %4472 = vmatpush3.bf16.msra.mxu1 %v4471_v50  ;;  %v654_v50 = vld [vmem:[%s5553_s5 + $0x8] sm:$0xff]  ;;  %v657_v55 = vld [vmem:[%s5554_s9] sm:$0xff] }
  0x8c   :  { %4473 = vmatprep.subr.bf16.mxu1 %v4797_v0  ;;  %v4510_v51 = vpack.c.bf16 %v654_v50, %v653_v49  ;;  %v3889_v57 = vld [vmem:[%s5555_s13] ss:$0 sm:$0xff]  ;;  %s5580_s13 = sld [smem:[#allocation33_spill]] }
  0x8d   :  { %v661_v46 = vld [vmem:[%s5560_s8] sm:$0xff] }
  0x8e   :  { %4484 = vmatpush3.bf16.msra.mxu0 %v4483_v17 }
  0x8f   :  { %4485 = vmatprep.subr.bf16.mxu0 %v4797_v0  ;;  %4475 = vmatpush3.bf16.msra.mxu1 %v4474_v53  ;;  %v656_v53 = vld [vmem:[%s5553_s5 + $0x18] sm:$0xff]  ;;  %s5578_s5 = sld [smem:[#allocation29_spill]] }
  0x90   :  { %4476 = vmatprep.subr.bf16.mxu1 %v4797_v0  ;;  %v4513_v54 = vpack.c.bf16 %v656_v53, %v655_v52 }
  0x92   :  { %4487 = vmatpush3.bf16.msra.mxu0 %v4486_v20 }
  0x93   :  { %4488 = vmatprep.subr.bf16.mxu0 %v4797_v0  ;;  %4478 = vmatpush3.bf16.msra.mxu1 %v4477_v56  ;;  %v658_v56 = vld [vmem:[%s5554_s9 + $0x8] sm:$0xff] }
  0x94   :  { %4491 = vmatprep.subr.bf16.mxu1 %v4797_v0 }
  0x96   :  { %4490 = vmatpush3.bf16.msra.mxu0 %v4489_v23 }
  0x97   :  { %4503 = vmatprep.subr.bf16.mxu0 %v4797_v0 }
  0x99   :  { %4163 = vmatmul.mubr.msk.f32.vlgmr.msra.gmra.mrb[2].mxu0 %vm317_vm2, %v434_v24 }
  0x9a   :  { %4192 = vmatprep.mubr.msk.f32.mxu0 %vm4798_vm0, %v4799_v1  ;;  %4505 = vmatpush3.bf16.msra.mxu0 %v4504_v59  ;;  %v4516_v59 = vpack.c.bf16 %v658_v56, %v657_v55 }
  0x9b   :  { %4506 = vmatprep.subr.bf16.mxu0 %v4797_v0 }
  0x9e   :  { %4508 = vmatpush3.bf16.msra.mxu0 %v4507_v48 }
  0x9f   :  { %4515 = vmatprep.subr.bf16.mxu0 %v4797_v0 }
 0x15c   :  { %v313_v26 = vpop.f32.mrb[0].mxu0 }
 0x15d   :  { %v314_v27 = vadd.f32 %v3885_v25, %v313_v26  ;;  %v4126_v28 = vpop.f32.mrb[1].mxu0  ;;  %v446_v26 = vld [vmem:[%s4876_s30] sm:$0xff] }
 0x15f   :  { %v318_v29 = vsel %vm317_vm2, %v314_v27, 0.0 }
 0x160   :  { %319 = vadd.xlane.f32.xlu0 %v318_v29 }
 0x16c   :  { %v530_v31 = vpop.f32.mrb[2].mxu0 }
 0x16d   :  { %v531_v32 = vadd.f32 %v3891_v30, %v530_v31  ;;  %v4164_v33 = vpop.f32.mrb[3].mxu0 }
 0x16e   :  { %v448_v33 = vld [vmem:[%s4876_s30 + $0x10] sm:$0xff] }
 0x16f   :  { %v534_v34 = vsel %vm317_vm2, %v531_v32, 0.0 }
 0x170   :  { %535 = vadd.xlane.f32.xlu0 %v534_v34  ;;  %v449_v34 = vld [vmem:[%s4876_s30 + $0x18] sm:$0xff] }
 0x1ed   :  { %v320_v35 = vpop.xlane.xlu0 %319 }
 0x1ee   :  { %v322_v36 = vmul.f32 0.015625, %v320_v35  ;;  %v4495_v35 = vpack.c.bf16 %v449_v34, %v448_v33 }
 0x1f0   :  { %v323_v37 = vsub.f32 %v314_v27, %v322_v36  ;;  %v447_v27 = vld [vmem:[%s4876_s30 + $0x8] sm:$0xff]  ;;  %v450_v36 = vld [vmem:[%s4876_s30 + $0x20] sm:$0xff] }
 0x1f1   :  { %v4492_v30 = vpack.c.bf16 %v447_v27, %v446_v26 }
 0x1f2   :  { %v324_v38 = vmul.f32 %v323_v37, %v323_v37 }
 0x1f4   :  { %v325_v39 = vsel %vm317_vm2, %v324_v38, 0.0 }
 0x1f5   :  { %326 = vadd.xlane.f32.xlu1 %v325_v39  ;;  %v452_v39 = vld [vmem:[%s4876_s30 + $0x30] sm:$0xff] }
 0x1fd   :  { %v536_v40 = vpop.xlane.xlu0 %535 }
 0x1fe   :  { %v537_v41 = vmul.f32 0.015625, %v536_v40  ;;  %v453_v40 = vld [vmem:[%s4876_s30 + $0x38] sm:$0xff] }
 0x200   :  { %v538_v42 = vsub.f32 %v531_v32, %v537_v41 }
 0x202   :  { %v539_v43 = vmul.f32 %v538_v42, %v538_v42 }
 0x204   :  { %v540_v44 = vsel %vm317_vm2, %v539_v43, 0.0 }
 0x205   :  { %541 = vadd.xlane.f32.xlu1 %v540_v44 }
 0x282   :  { %v327_v60 = vpop.xlane.xlu1 %326 }
 0x283   :  { %v328_v61 = vmul.f32 0.015625, %v327_v60 }
 0x285   :  { %v329_v62 = vadd.f32 1e-05, %v328_v61 }
 0x287   :  { %4647 = vrsqrt.f32 %v329_v62  ;;  %v659_v62 = vld [vmem:[%s5554_s9 + $0x10] sm:$0xff] }
 0x291   :  { %v4648_v63 = vpop.eup %4647 }
 0x292   :  { %v331_v3 = vmul.f32 %v4648_v63, %v323_v37  ;;  %v542_v4 = vpop.xlane.xlu1 %541  ;;  %v451_v37 = vld [vmem:[%s4876_s30 + $0x28] sm:$0xff]  ;;  %v660_v63 = vld [vmem:[%s5554_s9 + $0x18] sm:$0xff]  ;;  %s5562_s30 = sld [smem:[#allocation19_spill]]  ;;  %s5579_s9 = sld [smem:[#allocation37_spill]] }
 0x293   :  { %v543_v5 = vmul.f32 0.015625, %v542_v4  ;;  %v4498_v38 = vpack.c.bf16 %v451_v37, %v450_v36 }
 0x294   :  { %v338_v7 = vmul.f32 %v3887_v2, %v331_v3  ;;  %v4519_v2 = vpack.c.bf16 %v660_v63, %v659_v62  ;;  %v3895_v3 = vld [vmem:[%s5556_s17] ss:$0 sm:$0xff]  ;;  %s5581_s17 = sld [smem:[#allocation34_spill]] }
 0x295   :  { %v544_v8 = vadd.f32 1e-05, %v543_v5 }
 0x296   :  { %v345_v9 = vadd.f32 %v3888_v6, %v338_v7  ;;  %v3897_v7 = vld [vmem:[%s5557_s21] ss:$0 sm:$0xff]  ;;  %s4804_s21 = smov 64  }
 0x297   :  { %4649 = vrsqrt.f32 %v544_v8 }
 0x298   :  { %v346_v10 = vmul.f32 %v345_v9, %v345_v9 }
 0x29a   :  { %v347_v11 = vmul.f32 %v346_v10, %v345_v9 }
 0x29c   :  { %v348_v12 = vmul.f32 0.044715, %v347_v11 }
 0x29e   :  { %v349_v13 = vadd.f32 %v348_v12, %v345_v9  ;;  %v3899_v12 = vld [vmem:[%s5558_s25] ss:$0 sm:$0xff]  ;;  %s4805_s25 = smov 6  }
 0x2a0   :  { %v350_v14 = vmul.f32 0.7978846, %v349_v13  ;;  %v3901_v13 = vld [vmem:[%s5559_s29] ss:$0 sm:$0xff]  ;;  %s4806_s29 = smov 96  }
 0x2a1   :  { %v4650_v15 = vpop.eup %4649 }
 0x2a2   :  { %v546_v17 = vmul.f32 %v4650_v15, %v538_v42  ;;  %4651 = vtanh.f32 %v350_v14  ;;  %v4501_v42 = vpack.c.bf16 %v453_v40, %v452_v39 }
 0x2a4   :  { %v553_v19 = vmul.f32 %v3893_v16, %v546_v17 }
 0x2a6   :  { %v560_v20 = vadd.f32 %v3894_v18, %v553_v19 }
 0x2a8   :  { %v561_v21 = vmul.f32 %v560_v20, %v560_v20 }
 0x2aa   :  { %v562_v22 = vmul.f32 %v561_v21, %v560_v20 }
 0x2ac   :  { %v4652_v23 = vpop.eup %4651  ;;  %v563_v24 = vmul.f32 0.044715, %v562_v22 }
 0x2ad   :  { %v352_v25 = vadd.f32 1.0, %v4652_v23 }
 0x2ae   :  { %v564_v28 = vadd.f32 %v563_v24, %v560_v20 }
 0x2af   :  { %v353_v29 = vmul.f32 0.5, %v352_v25 }
 0x2b0   :  { %v565_v31 = vmul.f32 0.7978846, %v564_v28 }
 0x2b1   :  { %v354_v32 = vmul.f32 %v353_v29, %v345_v9 }
 0x2b2   :  { %4653 = vtanh.f32 %v565_v31 }
 0x2b3   :  { %4144 = vmatmul.mubr.msk.f32.vlgmr.msra.gmra.mrb[0].mxu1 %vm317_vm2, %v354_v32 }
 0x2b4   :  { %4493 = vmatpush3.bf16.msra.mxu1 %v4492_v30  ;;  %4181 = vmatprep.mubr.msk.f32.mxu1 %vm4798_vm0, %v4799_v1 }
 0x2b5   :  { %4494 = vmatprep.subr.bf16.mxu1 %v4797_v0 }
 0x2b8   :  { %4496 = vmatpush3.bf16.msra.mxu1 %v4495_v35 }
 0x2b9   :  { %4497 = vmatprep.subr.bf16.mxu1 %v4797_v0 }
 0x2bc   :  { %v4654_v41 = vpop.eup %4653  ;;  %4499 = vmatpush3.bf16.msra.mxu1 %v4498_v38 }
 0x2bd   :  { %4500 = vmatprep.subr.bf16.mxu1 %v4797_v0  ;;  %v567_v43 = vadd.f32 1.0, %v4654_v41 }
 0x2bf   :  { %v568_v44 = vmul.f32 0.5, %v567_v43 }
 0x2c0   :  { %4502 = vmatpush3.bf16.msra.mxu1 %v4501_v42  ;;  %v662_v42 = vld [vmem:[%s5560_s8 + $0x8] sm:$0xff] }
 0x2c1   :  { %v569_v45 = vmul.f32 %v568_v44, %v560_v20  ;;  %4509 = vmatprep.subr.bf16.mxu1 %v4797_v0 }
 0x2c3   :  { %4182 = vmatmul.mubr.msk.f32.vlgmr.msra.gmra.mrb[2].mxu1 %vm317_vm2, %v569_v45 }
 0x2c4   :  { %4203 = vmatprep.mubr.msk.f32.mxu1 %vm4798_vm0, %v4799_v1  ;;  %4511 = vmatpush3.bf16.msra.mxu1 %v4510_v51 }
 0x2c5   :  { %4512 = vmatprep.subr.bf16.mxu1 %v4797_v0 }
 0x2c8   :  { %4514 = vmatpush3.bf16.msra.mxu1 %v4513_v54 }
 0x2c9   :  { %4217 = vmatprep.subr.mxu1 %v4799_v1 }
 0x386   :  { %v430_v58 = vpop.f32.mrb[0].mxu1 }
 0x387   :  { %v5154_v60 = vadd.f32 %v3889_v57, %v430_v58  ;;  %v4145_v61 = vpop.f32.mrb[1].mxu1 }
 0x389   :  { %4193 = vmatmul.mubr.msk.f32.vlgmr.msra.gmra.mrb[4].mxu0 %vm675_vm3, %v5154_v60 }
 0x38a   :  { %4517 = vmatpush3.bf16.msra.mxu0 %v4516_v59  ;;  %4214 = vmatprep.mubr.msk.f32.mxu0 %vm4798_vm0, %v4799_v1 }
 0x38b   :  { %4518 = vmatprep.subr.bf16.mxu0 %v4797_v0 }
 0x38e   :  { %4520 = vmatpush3.bf16.msra.mxu0 %v4519_v2 }
 0x38f   :  { %4222 = vmatprep.subr.mxu0 %v4799_v1 }
 0x396   :  { %v645_v4 = vpop.f32.mrb[2].mxu1 }
 0x397   :  { %v5165_v5 = vadd.f32 %v3895_v3, %v645_v4  ;;  %v4183_v6 = vpop.f32.mrb[3].mxu1 }
 0x399   :  { %4204 = vmatmul.mubr.msk.f32.vlgmr.msra.gmra.mrb[4].mxu1 %vm675_vm3, %v5165_v5  ;;  %4215 = vmatmul.mubr.msk.f32.vlgmr.msra.gmra.mrb[6].mxu0 %vm675_vm3, %v5165_v5 }
 0x39a   :  { %4219 = vmatprep.mubr.msk.f32.mxu1 %vm4798_vm0, %v4799_v1  ;;  %4224 = vmatprep.mubr.msk.f32.mxu0 %vm4798_vm0, %v4799_v1 }
 0x45c   :  { %v745_v8 = vpop.f32.mrb[4].mxu0 }
 0x45d   :  { %v746_v9 = vadd.f32 %v3897_v7, %v745_v8  ;;  %v4194_v10 = vpop.f32.mrb[5].mxu0 }
 0x45f   :  { %v5176_v11 = vmul.f32 0.35355338, %v746_v9 }
 0x461   :  { %1066 = vrot.lane.b32.xlu1 %v5176_v11, %s4800_s3 }
 0x46c   :  { %v825_v14 = vpop.f32.mrb[4].mxu1  ;;  %v901_v15 = vpop.f32.mrb[6].mxu0 }
 0x46d   :  { %v5182_v16 = vadd.f32 %v3899_v12, %v825_v14  ;;  %v5184_v17 = vadd.f32 %v3901_v13, %v901_v15  ;;  %v4205_v18 = vpop.f32.mrb[5].mxu1  ;;  %v4216_v19 = vpop.f32.mrb[7].mxu0  ;;  %v663_v12 = vld [vmem:[%s5560_s8 + $0x10] sm:$0xff] }
 0x46f   :  { %1068 = vrot.lane.b32.xlu0 %v5182_v16, %s4800_s3  ;;  %4218 = vmatpush3.xpose.msk.msra.mxu1 %vm905_vm4, %v5182_v16 }
 0x470   :  { %4223 = vmatpush3.msra.mxu0 %v5184_v17  ;;  %4227 = vmatprep.subr.mxu1 %v4799_v1 }
 0x471   :  { %4232 = vmatprep.subr.mxu0 %v4799_v1 }
 0x472   :  { %4220 = vmatmul.mubr.msk.f32.vlgmr.msra.gmra.mrb[6].mxu1 %vm905_vm4, %v5176_v11 }
 0x473   :  { %4229 = vmatprep.mubr.msk.f32.mxu1 %vm4798_vm0, %v4799_v1 }
 0x4d3   :  { %v1067_v21 = vpop.permute.xlu1 %1066 }
 0x4e1   :  { %v1069_v20 = vpop.permute.xlu0 %1068 }
 0x4e2   :  { %4228 = vmatpush3.xpose.msk.msra.mxu1 %vm905_vm4, %v1069_v20 }
 0x4e3   :  { %4237 = vmatprep.subr.mxu1 %v4799_v1 }
 0x4e5   :  { %4230 = vmatmul.mubr.msk.f32.vlgmr.msra.gmra.mrb[8].mxu1 %vm905_vm4, %v1067_v21 }
 0x4e6   :  { %4239 = vmatprep.mubr.msk.f32.mxu1 %vm4798_vm0, %v4799_v1  ;;  %4238 = vmatpush3.msra.mxu1 %v662_v42 }
 0x4e7   :  { %4247 = vmatprep.subr.mxu1 %v4799_v1 }
 0x545   :  { %v978_v22 = vpop.f32.mrb[6].mxu1 }
 0x546   :  { %v4221_v23 = vpop.f32.mrb[7].mxu1  ;;  %v982_v24 = vsel %vm905_vm4, %v978_v22, -inf }
 0x547   :  { %983 = vmax.xlane.f32.xlu1 %v982_v24 }
 0x5b8   :  { %v1140_v25 = vpop.f32.mrb[8].mxu1 }
 0x5b9   :  { %v4231_v26 = vpop.f32.mrb[9].mxu1  ;;  %v1144_v27 = vsel %vm905_vm4, %v1140_v25, -inf }
 0x5ba   :  { %1145 = vmax.xlane.f32.xlu0 %v1144_v27 }
 0x5d4   :  { %v984_v28 = vpop.xlane.xlu1 %983 }
 0x5d5   :  { %v985_v29 = vsub.f32 %v978_v22, %v984_v28 }
 0x5d7   :  { %v986_v30 = vmul.f32 1.442695, %v985_v29  ;;  %v1863_v29 = vld [vmem:[%s5561_s24] sm:$0xff] }
 0x5d9   :  { %4655 = vpow2.f32 %v986_v30  ;;  %v1864_v30 = vld [vmem:[%s5561_s24 + $0x8] sm:$0xff] }
 0x5e3   :  { %v4656_v31 = vpop.eup %4655 }
 0x5e4   :  { %v988_v32 = vsel %vm905_vm4, %v4656_v31, 0.0 }
 0x5e5   :  { %989 = vadd.xlane.f32.xlu0 %v988_v32  ;;  %v4522_v32 = vpack.c.bf16 %v1864_v30, %v1863_v29  ;;  %v1876_v29 = vld [vmem:[%s5567_s18 + $0x8] sm:$0xff] }
 0x5fb   :  { %1156 = vrot.lane.b32.xlu0 %v5184_v17, %s4800_s3 }
 0x647   :  { %v1146_v33 = vpop.xlane.xlu0 %1145 }
 0x648   :  { %v1147_v34 = vsub.f32 %v1140_v25, %v1146_v33  ;;  %v664_v25 = vld [vmem:[%s5560_s8 + $0x18] sm:$0xff] }
 0x64a   :  { %v1148_v35 = vmul.f32 1.442695, %v1147_v34  ;;  %v1865_v34 = vld [vmem:[%s5561_s24 + $0x10] sm:$0xff] }
 0x64c   :  { %4657 = vpow2.f32 %v1148_v35  ;;  %v1866_v35 = vld [vmem:[%s5561_s24 + $0x18] sm:$0xff] }
 0x656   :  { %v4658_v36 = vpop.eup %4657 }
 0x657   :  { %v1150_v37 = vsel %vm905_vm4, %v4658_v36, 0.0 }
 0x658   :  { %1151 = vadd.xlane.f32.xlu1 %v1150_v37  ;;  %v1871_v37 = vld [vmem:[%s5562_s30] sm:$0xff] }
 0x669   :  { %1380 = vrot.lane.b32.xlu1 %v5182_v16, %s4801_s14 }
 0x66d   :  { %1378 = vrot.lane.b32.xlu1 %v5176_v11, %s4801_s14 }
 0x672   :  { %v990_v38 = vpop.xlane.xlu0 %989 }
 0x673   :  { %4659 = vrcp.f32 %v990_v38  ;;  %v1872_v38 = vld [vmem:[%s5562_s30 + $0x8] sm:$0xff] }
 0x676   :  { %v1157_v41 = vpop.permute.xlu0 %1156 }
 0x67d   :  { %v4660_v39 = vpop.eup %4659 }
 0x67e   :  { %v992_v40 = vmul.f32 %v4660_v39, %v4656_v31  ;;  %v4534_v39 = vpack.c.bf16 %v1872_v38, %v1871_v37 }
 0x680   :  { %4225 = vmatmul.mubr.msk.f32.vlgmr.msra.gmra.mrb[8].mxu0 %vm905_vm4, %v992_v40  ;;  %v1873_v40 = vld [vmem:[%s5562_s30 + $0x10] sm:$0xff] }
 0x681   :  { %4233 = vmatpush3.msra.mxu0 %v1157_v41  ;;  %4234 = vmatprep.mubr.msk.f32.mxu0 %vm4798_vm0, %v4799_v1  ;;  %v1874_v41 = vld [vmem:[%s5562_s30 + $0x18] sm:$0xff] }
 0x682   :  { %4242 = vmatprep.subr.mxu0 %v4799_v1  ;;  %v4537_v42 = vpack.c.bf16 %v1874_v41, %v1873_v40 }
 0x6e5   :  { %v1152_v43 = vpop.xlane.xlu1 %1151 }
 0x6e6   :  { %4661 = vrcp.f32 %v1152_v43  ;;  %v1867_v43 = vld [vmem:[%s5563_s6] sm:$0xff] }
 0x6e9   :  { %v1381_v49 = vpop.permute.xlu1 %1380 }
 0x6ed   :  { %v1379_v52 = vpop.permute.xlu1 %1378 }
 0x6f0   :  { %v4662_v44 = vpop.eup %4661 }
 0x6f1   :  { %v1154_v45 = vmul.f32 %v4662_v44, %v4658_v36  ;;  %v4525_v36 = vpack.c.bf16 %v1866_v35, %v1865_v34  ;;  %v1868_v44 = vld [vmem:[%s5563_s6 + $0x8] sm:$0xff] }
 0x6f3   :  { %4235 = vmatmul.mubr.msk.f32.vlgmr.msra.gmra.mrb[10].mxu0 %vm905_vm4, %v1154_v45  ;;  %v4528_v45 = vpack.c.bf16 %v1868_v44, %v1867_v43 }
 0x6f4   :  { %4243 = vmatpush3.msra.mxu0 %v661_v46  ;;  %4244 = vmatprep.mubr.msk.f32.mxu0 %vm4798_vm0, %v4799_v1  ;;  %v1869_v46 = vld [vmem:[%s5563_s6 + $0x10] sm:$0xff] }
 0x6f5   :  { %4252 = vmatprep.subr.mxu0 %v4799_v1 }
 0x753   :  { %v1062_v47 = vpop.f32.mrb[8].mxu0 }
 0x754   :  { %v4226_v48 = vpop.f32.mrb[9].mxu0  ;;  %4245 = vmatmul.mubr.msk.f32.vlgmr.msra.gmra.mrb[12].mxu0 %vm905_vm4, %v1062_v47  ;;  %v1870_v47 = vld [vmem:[%s5563_s6 + $0x18] sm:$0xff] }
 0x755   :  { %4254 = vmatprep.mubr.msk.f32.mxu0 %vm4798_vm0, %v4799_v1 }
 0x7c6   :  { %v1228_v50 = vpop.f32.mrb[10].mxu0 }
 0x7c7   :  { %v4236_v51 = vpop.f32.mrb[11].mxu0  ;;  %4240 = vmatmul.mubr.msk.f32.vlgmr.msra.gmra.mrb[10].mxu1 %vm905_vm4, %v1228_v50  ;;  %v4531_v50 = vpack.c.bf16 %v1870_v47, %v1869_v46 }
 0x7c8   :  { %4248 = vmatpush3.xpose.msk.msra.mxu1 %vm905_vm4, %v1381_v49  ;;  %4249 = vmatprep.mubr.msk.f32.mxu1 %vm4798_vm0, %v4799_v1  ;;  %v3920_v51 = vld [vmem:[%s5564_s12] ss:$0 sm:$0xff] }
 0x7c9   :  { %4257 = vmatprep.subr.mxu1 %v4799_v1 }
 0x7cb   :  { %4250 = vmatmul.mubr.msk.f32.vlgmr.msra.gmra.mrb[12].mxu1 %vm905_vm4, %v1379_v52 }
 0x7cc   :  { %4259 = vmatprep.mubr.msk.f32.mxu1 %vm4798_vm0, %v4799_v1  ;;  %4258 = vmatpush3.msra.mxu1 %v663_v12 }
 0x7cd   :  { %4267 = vmatprep.subr.mxu1 %v4799_v1 }
 0x827   :  { %v1374_v53 = vpop.f32.mrb[12].mxu0 }
 0x828   :  { %v4246_v54 = vpop.f32.mrb[13].mxu0 }
 0x89a   :  { %v1301_v55 = vpop.f32.mrb[10].mxu1 }
 0x89b   :  { %v1375_v56 = vadd.f32 %v1374_v53, %v1301_v55  ;;  %v4241_v57 = vpop.f32.mrb[11].mxu1 }
 0x89e   :  { %v1452_v58 = vpop.f32.mrb[12].mxu1 }
 0x89f   :  { %v4251_v59 = vpop.f32.mrb[13].mxu1  ;;  %v1456_v61 = vsel %vm905_vm4, %v1452_v58, -inf }
 0x8a0   :  { %1457 = vmax.xlane.f32.xlu1 %v1456_v61 }
 0x8b1   :  { %1619 = vrot.lane.b32.xlu1 %v5182_v16, %s4802_s19 }
 0x8b5   :  { %1617 = vrot.lane.b32.xlu1 %v5176_v11, %s4802_s19 }
 0x92d   :  { %v1458_v62 = vpop.xlane.xlu1 %1457 }
 0x92e   :  { %v1459_v63 = vsub.f32 %v1452_v58, %v1458_v62  ;;  %v3922_v62 = vld [vmem:[%s5565_s15] ss:$0 sm:$0xff] }
 0x930   :  { %v1460_v2 = vmul.f32 1.442695, %v1459_v63 }
 0x931   :  { %v1620_v9 = vpop.permute.xlu1 %1619 }
 0x932   :  { %4663 = vpow2.f32 %v1460_v2 }
 0x935   :  { %v1618_v11 = vpop.permute.xlu1 %1617 }
 0x93c   :  { %v4664_v3 = vpop.eup %4663 }
 0x93d   :  { %v1462_v4 = vsel %vm905_vm4, %v4664_v3, 0.0 }
 0x93e   :  { %1463 = vadd.xlane.f32.xlu0 %v1462_v4  ;;  %v3924_v4 = vld [vmem:[%s5566_s16] ss:$0 sm:$0xff] }
 0x954   :  { %1467 = vrot.lane.b32.xlu0 %v5184_v17, %s4801_s14 }
 0x9cb   :  { %v1464_v6 = vpop.xlane.xlu0 %1463 }
 0x9cc   :  { %4665 = vrcp.f32 %v1464_v6 }
 0x9cf   :  { %v1468_v7 = vpop.permute.xlu0 %1467 }
 0x9d0   :  { %4253 = vmatpush3.msra.mxu0 %v1468_v7 }
 0x9d1   :  { %4262 = vmatprep.subr.mxu0 %v4799_v1 }
 0x9d6   :  { %v4666_v8 = vpop.eup %4665 }
 0x9d7   :  { %v1466_v10 = vmul.f32 %v4666_v8, %v4664_v3 }
 0x9d9   :  { %4255 = vmatmul.mubr.msk.f32.vlgmr.msra.gmra.mrb[14].mxu0 %vm905_vm4, %v1466_v10 }
 0x9da   :  { %4263 = vmatpush3.xpose.msk.msra.mxu0 %vm905_vm4, %v1620_v9  ;;  %4264 = vmatprep.mubr.msk.f32.mxu0 %vm4798_vm0, %v4799_v1 }
 0x9db   :  { %4272 = vmatprep.subr.mxu0 %v4799_v1 }
 0x9dd   :  { %4265 = vmatmul.mubr.msk.f32.vlgmr.msra.gmra.mrb[16].mxu0 %vm905_vm4, %v1618_v11 }
 0x9de   :  { %4274 = vmatprep.mubr.msk.f32.mxu0 %vm4798_vm0, %v4799_v1  ;;  %4273 = vmatpush3.msra.mxu0 %v664_v25 }
 0x9df   :  { %4527 = vmatprep.subr.bf16.mxu0 %v4797_v0 }
 0xaac   :  { %v1539_v13 = vpop.f32.mrb[14].mxu0 }
 0xaad   :  { %v4256_v14 = vpop.f32.mrb[15].mxu0  ;;  %4260 = vmatmul.mubr.msk.f32.vlgmr.msra.gmra.mrb[14].mxu1 %vm905_vm4, %v1539_v13 }
 0xaae   :  { %4269 = vmatprep.mubr.msk.f32.mxu1 %vm4798_vm0, %v4799_v1 }
 0xab0   :  { %v1691_v15 = vpop.f32.mrb[16].mxu0 }
 0xab1   :  { %v4266_v16 = vpop.f32.mrb[17].mxu0  ;;  %v1695_v18 = vsel %vm905_vm4, %v1691_v15, -inf }
 0xab2   :  { %1696 = vmax.xlane.f32.xlu0 %v1695_v18 }
 0xac8   :  { %1706 = vrot.lane.b32.xlu0 %v5184_v17, %s4802_s19 }
 0xb3f   :  { %v1697_v19 = vpop.xlane.xlu0 %1696 }
 0xb40   :  { %v1698_v20 = vsub.f32 %v1691_v15, %v1697_v19 }
 0xb42   :  { %v1699_v21 = vmul.f32 1.442695, %v1698_v20 }
 0xb43   :  { %v1707_v22 = vpop.permute.xlu0 %1706 }
 0xb44   :  { %4667 = vpow2.f32 %v1699_v21  ;;  %4268 = vmatpush3.msra.mxu1 %v1707_v22 }
 0xb45   :  { %4521 = vmatprep.subr.bf16.mxu1 %v4797_v0 }
 0xb4e   :  { %v4668_v23 = vpop.eup %4667 }
 0xb4f   :  { %v1701_v24 = vsel %vm905_vm4, %v4668_v23, 0.0 }
 0xb50   :  { %1702 = vadd.xlane.f32.xlu1 %v1701_v24 }
 0xb80   :  { %v1612_v17 = vpop.f32.mrb[14].mxu1 }
 0xb81   :  { %v1616_v26 = vadd.f32 %v1612_v17, %v1375_v56  ;;  %v4261_v27 = vpop.f32.mrb[15].mxu1 }
 0xbdd   :  { %v1703_v28 = vpop.xlane.xlu1 %1702 }
 0xbde   :  { %4669 = vrcp.f32 %v1703_v28 }
 0xbe8   :  { %v4670_v31 = vpop.eup %4669 }
 0xbe9   :  { %v1705_v33 = vmul.f32 %v4670_v31, %v4668_v23 }
 0xbeb   :  { %4270 = vmatmul.mubr.msk.f32.vlgmr.msra.gmra.mrb[16].mxu1 %vm905_vm4, %v1705_v33  ;;  %v1875_v33 = vld [vmem:[%s5567_s18] sm:$0xff] }
 0xbec   :  { %4523 = vmatpush3.bf16.msra.mxu1 %v4522_v32  ;;  %4285 = vmatprep.mubr.msk.f32.mxu1 %vm4798_vm0, %v4799_v1 }
 0xbed   :  { %4524 = vmatprep.subr.bf16.mxu1 %v4797_v0 }
 0xbf0   :  { %4526 = vmatpush3.bf16.msra.mxu1 %v4525_v36 }
 0xbf1   :  { %4533 = vmatprep.subr.bf16.mxu1 %v4797_v0 }
 0xbf3   :  { %4286 = vmatmul.mubr.msk.f32.vlgmr.msra.gmra.mrb[18].mxu1 %vm675_vm3, %v5165_v5 }
 0xbf4   :  { %4535 = vmatpush3.bf16.msra.mxu1 %v4534_v39  ;;  %4307 = vmatprep.mubr.msk.f32.mxu1 %vm4798_vm0, %v4799_v1 }
 0xbf5   :  { %4536 = vmatprep.subr.bf16.mxu1 %v4797_v0 }
 0xbf8   :  { %4538 = vmatpush3.bf16.msra.mxu1 %v4537_v42 }
 0xbf9   :  { %4320 = vmatprep.subr.mxu1 %v4799_v1 }
 0xbfb   :  { %4308 = vmatmul.mubr.msk.f32.vlgmr.msra.gmra.mrb[20].mxu1 %vm675_vm3, %v5154_v60 }
 0xbfc   :  { %4322 = vmatprep.mubr.msk.f32.mxu1 %vm4798_vm0, %v4799_v1 }
 0xcbe   :  { %v1778_v48 = vpop.f32.mrb[16].mxu1 }
 0xcbf   :  { %v4271_v49 = vpop.f32.mrb[17].mxu1  ;;  %4275 = vmatmul.mubr.msk.f32.vlgmr.msra.gmra.mrb[18].mxu0 %vm905_vm4, %v1778_v48 }
 0xcc0   :  { %4529 = vmatpush3.bf16.msra.mxu0 %v4528_v45  ;;  %4296 = vmatprep.mubr.msk.f32.mxu0 %vm4798_vm0, %v4799_v1 }
 0xcc1   :  { %4530 = vmatprep.subr.bf16.mxu0 %v4797_v0 }
 0xcc4   :  { %4532 = vmatpush3.bf16.msra.mxu0 %v4531_v50 }
 0xcc5   :  { %4310 = vmatprep.subr.mxu0 %v4799_v1 }
 0xcc6   :  { %v1955_v52 = vpop.f32.mrb[18].mxu1 }
 0xcc7   :  { %v1956_v53 = vadd.f32 %v3920_v51, %v1955_v52  ;;  %v4287_v54 = vpop.f32.mrb[19].mxu1  ;;  %4297 = vmatmul.mubr.msk.f32.vlgmr.msra.gmra.mrb[20].mxu0 %vm675_vm3, %v5154_v60 }
 0xcc8   :  { %4312 = vmatprep.mubr.msk.f32.mxu0 %vm4798_vm0, %v4799_v1  ;;  %v5369_v54 = vld [vmem:[%s5051_s20] sm:$0xff] }
 0xcc9   :  { %v5300_v55 = vmul.f32 0.35355338, %v1956_v53 }
 0xccb   :  { %2272 = vrot.lane.b32.xlu0 %v5300_v55, %s4800_s3 }
 0xcce   :  { %v2108_v56 = vpop.f32.mrb[20].mxu1 }
 0xccf   :  { %v4309_v57 = vpop.f32.mrb[21].mxu1  ;;  %v5315_v6 = vadd.f32 %v3924_v4, %v2108_v56 }
 0xd3d   :  { %v2273_v8 = vpop.permute.xlu0 %2272 }
 0xd92   :  { %v1851_v58 = vpop.f32.mrb[18].mxu0 }
 0xd93   :  { %v5304_v59 = vadd.f32 %v1851_v58, %v1616_v26  ;;  %v4276_v61 = vpop.f32.mrb[19].mxu0 }
 0xd94   :  { %v1877_v61 = vld [vmem:[%s5567_s18 + $0x10] sm:$0xff] }
 0xd9a   :  { %v2032_v63 = vpop.f32.mrb[20].mxu0 }
 0xd9b   :  { %v5307_v2 = vadd.f32 %v3922_v62, %v2032_v63  ;;  %v4298_v3 = vpop.f32.mrb[21].mxu0 }
 0xd9d   :  { %2274 = vrot.lane.b32.xlu1 %v5307_v2, %s4800_s3  ;;  %4311 = vmatpush3.xpose.msk.msra.mxu0 %vm905_vm4, %v5307_v2 }
 0xd9e   :  { %4315 = vmatprep.subr.mxu0 %v4799_v1 }
 0xda0   :  { %4313 = vmatmul.mubr.msk.f32.vlgmr.msra.gmra.mrb[22].mxu0 %vm905_vm4, %v5300_v55 }
 0xda1   :  { %4316 = vmatpush3.msra.mxu0 %v5315_v6  ;;  %4317 = vmatprep.mubr.msk.f32.mxu0 %vm4798_vm0, %v4799_v1 }
 0xda2   :  { %4325 = vmatprep.subr.mxu0 %v4799_v1 }
 0xe0f   :  { %v2275_v7 = vpop.permute.xlu1 %2274 }
 0xe10   :  { %4321 = vmatpush3.xpose.msk.msra.mxu1 %vm905_vm4, %v2275_v7 }
 0xe11   :  { %4330 = vmatprep.subr.mxu1 %v4799_v1 }
 0xe13   :  { %4323 = vmatmul.mubr.msk.f32.vlgmr.msra.gmra.mrb[22].mxu1 %vm905_vm4, %v2273_v8 }
 0xe14   :  { %4332 = vmatprep.mubr.msk.f32.mxu1 %vm4798_vm0, %v4799_v1  ;;  %4331 = vmatpush3.msra.mxu1 %v1876_v29 }
 0xe15   :  { %4340 = vmatprep.subr.mxu1 %v4799_v1 }
 0xe73   :  { %v2184_v9 = vpop.f32.mrb[22].mxu0 }
 0xe74   :  { %v4314_v10 = vpop.f32.mrb[23].mxu0  ;;  %v2188_v11 = vsel %vm905_vm4, %v2184_v9, -inf }
 0xe75   :  { %2189 = vmax.xlane.f32.xlu1 %v2188_v11 }
 0xe86   :  { %2362 = vrot.lane.b32.xlu1 %v5315_v6, %s4800_s3  ;;  %s4807_s3 = smov 12  }
 0xe8a   :  { %2584 = vrot.lane.b32.xlu1 %v5300_v55, %s4801_s14 }
 0xee6   :  { %v2346_v12 = vpop.f32.mrb[22].mxu1 }
 0xee7   :  { %v4324_v13 = vpop.f32.mrb[23].mxu1  ;;  %v2350_v14 = vsel %vm905_vm4, %v2346_v12, -inf }
 0xee8   :  { %2351 = vmax.xlane.f32.xlu0 %v2350_v14 }
 0xf02   :  { %v2190_v15 = vpop.xlane.xlu1 %2189 }
 0xf03   :  { %v2191_v16 = vsub.f32 %v2184_v9, %v2190_v15 }
 0xf05   :  { %v2192_v18 = vmul.f32 1.442695, %v2191_v16 }
 0xf06   :  { %v2363_v28 = vpop.permute.xlu1 %2362 }
 0xf07   :  { %4671 = vpow2.f32 %v2192_v18 }
 0xf0a   :  { %v2585_v39 = vpop.permute.xlu1 %2584 }
 0xf11   :  { %v4672_v19 = vpop.eup %4671 }
 0xf12   :  { %v2194_v20 = vsel %vm905_vm4, %v4672_v19, 0.0 }
 0xf13   :  { %2195 = vadd.xlane.f32.xlu0 %v2194_v20  ;;  %v3074_v20 = vld [vmem:[%s5568_s22 + $0x8] sm:$0xff] }
 0xf75   :  { %v2352_v21 = vpop.xlane.xlu0 %2351 }
 0xf76   :  { %v2353_v22 = vsub.f32 %v2346_v12, %v2352_v21  ;;  %v1878_v12 = vld [vmem:[%s5567_s18 + $0x18] sm:$0xff] }
 0xf78   :  { %v2354_v23 = vmul.f32 1.442695, %v2353_v22 }
 0xf7a   :  { %4673 = vpow2.f32 %v2354_v23  ;;  %v3075_v23 = vld [vmem:[%s5568_s22 + $0x10] sm:$0xff] }
 0xf84   :  { %v4674_v24 = vpop.eup %4673 }
 0xf85   :  { %v2356_v25 = vsel %vm905_vm4, %v4674_v24, 0.0 }
 0xf86   :  { %2357 = vadd.xlane.f32.xlu0 %v2356_v25 }
 0xf9c   :  { %2586 = vrot.lane.b32.xlu0 %v5307_v2, %s4801_s14 }
 0xfa0   :  { %v2196_v17 = vpop.xlane.xlu0 %2195 }
 0xfa1   :  { %4675 = vrcp.f32 %v2196_v17  ;;  %v3919_v17 = vld [vmem:[%s5569_s23] ss:$0 sm:$0xff] }
 0xfab   :  { %v4676_v26 = vpop.eup %4675 }
 0xfac   :  { %v2198_v27 = vmul.f32 %v4676_v26, %v4672_v19  ;;  %v3073_v19 = vld [vmem:[%s5568_s22] sm:$0xff]  ;;  %v1862_v26 = vadd.f32 %v3919_v17, %v5304_v59  ;;  %v3071_v59 = vld [vmem:[%s5571_s28 + $0x10] sm:$0xff] }
 0xfad   :  { %v4540_v21 = vpack.c.bf16 %v3074_v20, %v3073_v19 }
 0xfae   :  { %4318 = vmatmul.mubr.msk.f32.vlgmr.msra.gmra.mrb[24].mxu0 %vm905_vm4, %v2198_v27  ;;  %v3276_v27 = vld [vmem:[%s5570_s26] sm:$0xff] }
 0xfaf   :  { %4326 = vmatpush3.msra.mxu0 %v2363_v28  ;;  %4327 = vmatprep.mubr.msk.f32.mxu0 %vm4798_vm0, %v4799_v1  ;;  %v3277_v28 = vld [vmem:[%s5570_s26 + $0x8] sm:$0xff] }
 0xfb0   :  { %4335 = vmatprep.subr.mxu0 %v4799_v1  ;;  %v4552_v29 = vpack.c.bf16 %v3277_v28, %v3276_v27  ;;  %v3947_v28 = vld [vmem:[%s5578_s5] ss:$0 sm:$0xff] }
0x1013   :  { %v2358_v30 = vpop.xlane.xlu0 %2357 }
0x1014   :  { %4677 = vrcp.f32 %v2358_v30  ;;  %v3069_v30 = vld [vmem:[%s5571_s28] sm:$0xff] }
0x1017   :  { %v2587_v37 = vpop.permute.xlu0 %2586 }
0x101e   :  { %v4678_v31 = vpop.eup %4677 }
0x101f   :  { %v2360_v32 = vmul.f32 %v4678_v31, %v4674_v24  ;;  %v3076_v24 = vld [vmem:[%s5568_s22 + $0x18] sm:$0xff]  ;;  %v3070_v31 = vld [vmem:[%s5571_s28 + $0x8] sm:$0xff] }
0x1020   :  { %v4543_v25 = vpack.c.bf16 %v3076_v24, %v3075_v23 }
0x1021   :  { %4328 = vmatmul.mubr.msk.f32.vlgmr.msra.gmra.mrb[26].mxu0 %vm905_vm4, %v2360_v32  ;;  %v4546_v32 = vpack.c.bf16 %v3070_v31, %v3069_v30 }
0x1022   :  { %4336 = vmatpush3.msra.mxu0 %v1875_v33  ;;  %4337 = vmatprep.mubr.msk.f32.mxu0 %vm4798_vm0, %v4799_v1  ;;  %v3072_v33 = vld [vmem:[%s5571_s28 + $0x18] sm:$0xff] }
0x1023   :  { %4345 = vmatprep.subr.mxu0 %v4799_v1 }
0x1081   :  { %v2268_v34 = vpop.f32.mrb[24].mxu0 }
0x1082   :  { %v4319_v35 = vpop.f32.mrb[25].mxu0  ;;  %4338 = vmatmul.mubr.msk.f32.vlgmr.msra.gmra.mrb[28].mxu0 %vm905_vm4, %v2268_v34 }
0x1083   :  { %4347 = vmatprep.mubr.msk.f32.mxu0 %vm4798_vm0, %v4799_v1 }
0x10f4   :  { %v2434_v36 = vpop.f32.mrb[26].mxu0 }
0x10f5   :  { %v4329_v38 = vpop.f32.mrb[27].mxu0  ;;  %4333 = vmatmul.mubr.msk.f32.vlgmr.msra.gmra.mrb[24].mxu1 %vm905_vm4, %v2434_v36  ;;  %v4549_v36 = vpack.c.bf16 %v3072_v33, %v3071_v59  ;;  %v3558_v59 = vld [vmem:[%s5579_s9] sm:$0xff]  ;;  %v3559_v33 = vld [vmem:[%s5579_s9 + $0x8] sm:$0xff] }
0x10f6   :  { %4341 = vmatpush3.xpose.msk.msra.mxu1 %vm905_vm4, %v2587_v37  ;;  %4342 = vmatprep.mubr.msk.f32.mxu1 %vm4798_vm0, %v4799_v1  ;;  %v3272_v37 = vld [vmem:[%s5572_s1] sm:$0xff]  ;;  %v3273_v38 = vld [vmem:[%s5572_s1 + $0x8] sm:$0xff] }
0x10f7   :  { %4350 = vmatprep.subr.mxu1 %v4799_v1 }
0x10f9   :  { %4343 = vmatmul.mubr.msk.f32.vlgmr.msra.gmra.mrb[26].mxu1 %vm905_vm4, %v2585_v39  ;;  %v4558_v39 = vpack.c.bf16 %v3273_v38, %v3272_v37  ;;  %v3560_v38 = vld [vmem:[%s5579_s9 + $0x10] sm:$0xff] }
0x10fa   :  { %4352 = vmatprep.mubr.msk.f32.mxu1 %vm4798_vm0, %v4799_v1  ;;  %4351 = vmatpush3.msra.mxu1 %v1877_v61 }
0x10fb   :  { %4360 = vmatprep.subr.mxu1 %v5369_v54 }
0x1155   :  { %v2580_v40 = vpop.f32.mrb[28].mxu0 }
0x1156   :  { %v4339_v41 = vpop.f32.mrb[29].mxu0 }
0x1157   :  { %v3275_v41 = vld [vmem:[%s5572_s1 + $0x18] sm:$0xff] }
0x11c8   :  { %v2507_v42 = vpop.f32.mrb[24].mxu1 }
0x11c9   :  { %v2581_v43 = vadd.f32 %v2580_v40, %v2507_v42  ;;  %v4334_v44 = vpop.f32.mrb[25].mxu1  ;;  %v3274_v40 = vld [vmem:[%s5572_s1 + $0x10] sm:$0xff] }
0x11ca   :  { %v4561_v44 = vpack.c.bf16 %v3275_v41, %v3274_v40  ;;  %v3648_v40 = vld [vmem:[%s5041_s4 + $0x10] sm:$0xff] }
0x11cc   :  { %v2658_v45 = vpop.f32.mrb[26].mxu1 }
0x11cd   :  { %v4344_v46 = vpop.f32.mrb[27].mxu1  ;;  %v2662_v47 = vsel %vm905_vm4, %v2658_v45, -inf }
0x11ce   :  { %2663 = vmax.xlane.f32.xlu1 %v2662_v47  ;;  %v3279_v46 = vld [vmem:[%s5570_s26 + $0x18] sm:$0xff]  ;;  %v3942_v47 = vld [vmem:[%s5573_s2] ss:$0 sm:$0xff] }
0x11df   :  { %2825 = vrot.lane.b32.xlu1 %v5307_v2, %s4802_s19 }
0x11e3   :  { %2823 = vrot.lane.b32.xlu1 %v5300_v55, %s4802_s19 }
0x125b   :  { %v2664_v48 = vpop.xlane.xlu1 %2663 }
0x125c   :  { %v2665_v49 = vsub.f32 %v2658_v45, %v2664_v48  ;;  %v3278_v45 = vld [vmem:[%s5570_s26 + $0x10] sm:$0xff] }
0x125e   :  { %v2666_v1 = vmul.f32 1.442695, %v2665_v49 }
0x125f   :  { %v2826_v56 = vpop.permute.xlu1 %2825 }
0x1260   :  { %4679 = vpow2.f32 %v2666_v1 }
0x1263   :  { %v2824_v58 = vpop.permute.xlu1 %2823 }
0x126a   :  { %v4680_v50 = vpop.eup %4679 }
0x126b   :  { %v2668_v51 = vsel %vm905_vm4, %v4680_v50, 0.0 }
0x126c   :  { %2669 = vadd.xlane.f32.xlu0 %v2668_v51  ;;  %v3945_v51 = vld [vmem:[%s5574_s0] ss:$0 sm:$0xff] }
0x1282   :  { %2673 = vrot.lane.b32.xlu0 %v5315_v6, %s4801_s14 }
0x12f9   :  { %v2670_v52 = vpop.xlane.xlu0 %2669 }
0x12fa   :  { %4681 = vrcp.f32 %v2670_v52 }
0x12fd   :  { %v2674_v53 = vpop.permute.xlu0 %2673 }
0x12fe   :  { %4346 = vmatpush3.msra.mxu0 %v2674_v53 }
0x12ff   :  { %4355 = vmatprep.subr.mxu0 %v5369_v54 }
0x1304   :  { %v4682_v55 = vpop.eup %4681 }
0x1305   :  { %v2672_v57 = vmul.f32 %v4682_v55, %v4680_v50 }
0x1307   :  { %4348 = vmatmul.mubr.msk.f32.vlgmr.msra.gmra.mrb[30].mxu0 %vm905_vm4, %v2672_v57 }
0x1308   :  { %4356 = vmatpush3.xpose.msk.msra.mxu0 %vm905_vm4, %v2826_v56  ;;  %4357 = vmatprep.mubr.msk.f32.mxu0 %vm4798_vm0, %v5369_v54 }
0x1309   :  { %4365 = vmatprep.subr.mxu0 %v5369_v54 }
0x130b   :  { %4358 = vmatmul.mubr.msk.f32.vlgmr.msra.gmra.mrb[32].mxu0 %vm905_vm4, %v2824_v58 }
0x130c   :  { %4367 = vmatprep.mubr.msk.f32.mxu0 %vm4798_vm0, %v5369_v54  ;;  %4366 = vmatpush3.msra.mxu0 %v1878_v12  ;;  %v3474_v12 = vld [vmem:[%s5576_s10] sm:$0xff] }
0x130d   :  { %4545 = vmatprep.subr.bf16.mxu0 %v4797_v0 }
0x13da   :  { %v2745_v62 = vpop.f32.mrb[30].mxu0 }
0x13db   :  { %v4349_v63 = vpop.f32.mrb[31].mxu0  ;;  %4353 = vmatmul.mubr.msk.f32.vlgmr.msra.gmra.mrb[28].mxu1 %vm905_vm4, %v2745_v62 }
0x13dc   :  { %4362 = vmatprep.mubr.msk.f32.mxu1 %vm4798_vm0, %v5369_v54 }
0x13de   :  { %v2897_v2 = vpop.f32.mrb[32].mxu0 }
0x13df   :  { %v4359_v3 = vpop.f32.mrb[33].mxu0  ;;  %v2901_v4 = vsel %vm905_vm4, %v2897_v2, -inf }
0x13e0   :  { %2902 = vmax.xlane.f32.xlu1 %v2901_v4 }
0x146d   :  { %v2903_v7 = vpop.xlane.xlu1 %2902 }
0x146e   :  { %v2904_v8 = vsub.f32 %v2897_v2, %v2903_v7  ;;  %v3950_v2 = vld [vmem:[%s5575_s7] ss:$0 sm:$0xff] }
0x1470   :  { %v2905_v9 = vmul.f32 1.442695, %v2904_v8 }
0x1472   :  { %4683 = vpow2.f32 %v2905_v9 }
0x147c   :  { %v4684_v10 = vpop.eup %4683 }
0x147d   :  { %v2907_v11 = vsel %vm905_vm4, %v4684_v10, 0.0 }
0x147e   :  { %2908 = vadd.xlane.f32.xlu0 %v2907_v11 }
0x1494   :  { %2912 = vrot.lane.b32.xlu0 %v5315_v6, %s4802_s19 }
0x14ae   :  { %v2818_v13 = vpop.f32.mrb[28].mxu1 }
0x14af   :  { %v5391_v14 = vadd.f32 %v2818_v13, %v2581_v43  ;;  %v4354_v15 = vpop.f32.mrb[29].mxu1  ;;  %v3475_v13 = vld [vmem:[%s5576_s10 + $0x8] sm:$0xff] }
0x14b0   :  { %v3476_v15 = vld [vmem:[%s5576_s10 + $0x10] sm:$0xff] }
0x150b   :  { %v2909_v16 = vpop.xlane.xlu0 %2908 }
0x150c   :  { %4685 = vrcp.f32 %v2909_v16  ;;  %v3477_v16 = vld [vmem:[%s5576_s10 + $0x18] sm:$0xff] }
0x150f   :  { %v2913_v18 = vpop.permute.xlu0 %2912 }
0x1510   :  { %4361 = vmatpush3.msra.mxu1 %v2913_v18  ;;  %v4567_v18 = vpack.c.bf16 %v3477_v16, %v3476_v15 }
0x1511   :  { %4539 = vmatprep.subr.bf16.mxu1 %v4797_v0 }
0x1516   :  { %v4686_v6 = vpop.eup %4685 }
0x1517   :  { %v2911_v22 = vmul.f32 %v4686_v6, %v4684_v10 }
0x1519   :  { %4363 = vmatmul.mubr.msk.f32.vlgmr.msra.gmra.mrb[30].mxu1 %vm905_vm4, %v2911_v22 }
0x151a   :  { %4541 = vmatpush3.bf16.msra.mxu1 %v4540_v21  ;;  %4378 = vmatprep.mubr.msk.f32.mxu1 %vm4798_vm0, %v5369_v54 }
0x151b   :  { %4542 = vmatprep.subr.bf16.mxu1 %v4797_v0 }
0x151e   :  { %4544 = vmatpush3.bf16.msra.mxu1 %v4543_v25 }
0x151f   :  { %4551 = vmatprep.subr.bf16.mxu1 %v4797_v0 }
0x1521   :  { %4379 = vmatmul.mubr.msk.f32.vlgmr.msra.gmra.mrb[32].mxu1 %vm675_vm3, %v1862_v26  ;;  %v3946_v26 = vld [vmem:[%s5577_s11] ss:$0 sm:$0xff] }
0x1522   :  { %4400 = vmatprep.mubr.msk.f32.mxu1 %vm4798_vm0, %v5369_v54  ;;  %4553 = vmatpush3.bf16.msra.mxu1 %v4552_v29 }
0x1523   :  { %4554 = vmatprep.subr.bf16.mxu1 %v4797_v0 }
0x15ec   :  { %v2984_v34 = vpop.f32.mrb[30].mxu1 }
0x15ed   :  { %v4364_v35 = vpop.f32.mrb[31].mxu1  ;;  %4368 = vmatmul.mubr.msk.f32.vlgmr.msra.gmra.mrb[34].mxu0 %vm905_vm4, %v2984_v34  ;;  %v4570_v34 = vpack.c.bf16 %v3559_v33, %v3558_v59 }
0x15ee   :  { %4547 = vmatpush3.bf16.msra.mxu0 %v4546_v32  ;;  %4389 = vmatprep.mubr.msk.f32.mxu0 %vm4798_vm0, %v5369_v54  ;;  %v3646_v35 = vld [vmem:[%s5041_s4] sm:$0xff] }
0x15ef   :  { %4548 = vmatprep.subr.bf16.mxu0 %v4797_v0 }
0x15f2   :  { %4550 = vmatpush3.bf16.msra.mxu0 %v4549_v36  ;;  %v3647_v36 = vld [vmem:[%s5041_s4 + $0x8] sm:$0xff] }
0x15f3   :  { %4557 = vmatprep.subr.bf16.mxu0 %v4797_v0  ;;  %v4576_v37 = vpack.c.bf16 %v3647_v36, %v3646_v35 }
0x15f4   :  { %v3149_v42 = vpop.f32.mrb[32].mxu1 }
0x15f5   :  { %v4380_v43 = vpop.f32.mrb[33].mxu1  ;;  %4390 = vmatmul.mubr.msk.f32.vlgmr.msra.gmra.mrb[36].mxu0 %vm675_vm3, %v5154_v60  ;;  %v4555_v60 = vpack.c.bf16 %v3279_v46, %v3278_v45 }
0x15f6   :  { %4559 = vmatpush3.bf16.msra.mxu0 %v4558_v39  ;;  %4411 = vmatprep.mubr.msk.f32.mxu0 %vm4798_vm0, %v5369_v54  ;;  %v3561_v39 = vld [vmem:[%s5579_s9 + $0x18] sm:$0xff] }
0x15f7   :  { %4560 = vmatprep.subr.bf16.mxu0 %v4797_v0  ;;  %4556 = vmatpush3.bf16.msra.mxu1 %v4555_v60  ;;  %v4573_v41 = vpack.c.bf16 %v3561_v39, %v3560_v38 }
0x15f8   :  { %4563 = vmatprep.subr.bf16.mxu1 %v4797_v0 }
0x15fa   :  { %4562 = vmatpush3.bf16.msra.mxu0 %v4561_v44 }
0x15fb   :  { %4569 = vmatprep.subr.bf16.mxu0 %v4797_v0 }
0x15fd   :  { %4412 = vmatmul.mubr.msk.f32.vlgmr.msra.gmra.mrb[38].mxu0 %vm675_vm3, %v5165_v5 }
0x15fe   :  { %4433 = vmatprep.mubr.msk.f32.mxu0 %vm4798_vm0, %v5369_v54  ;;  %4571 = vmatpush3.bf16.msra.mxu0 %v4570_v34 }
0x15ff   :  { %4572 = vmatprep.subr.bf16.mxu0 %v4797_v0 }
0x1602   :  { %4574 = vmatpush3.bf16.msra.mxu0 %v4573_v41 }
0x1603   :  { %4581 = vmatprep.subr.bf16.mxu0 %v4797_v0 }
0x16c0   :  { %v3057_v48 = vpop.f32.mrb[34].mxu0 }
0x16c1   :  { %v3061_v49 = vadd.f32 %v3057_v48, %v5391_v14  ;;  %v4369_v1 = vpop.f32.mrb[35].mxu0  ;;  %v4564_v14 = vpack.c.bf16 %v3475_v13, %v3474_v12 }
0x16c2   :  { %v3643_v1 = vld [vmem:[%s5036_s27 + $0x8] sm:$0xff] }
0x16c3   :  { %v3068_v50 = vadd.f32 %v3942_v47, %v3061_v49  ;;  %v3951_v47 = vld [vmem:[%s5580_s13] ss:$0 sm:$0xff] }
0x16c4   :  { %v3642_v49 = vld [vmem:[%s5036_s27] sm:$0xff] }
0x16c5   :  { %4401 = vmatmul.mubr.msk.f32.vlgmr.msra.gmra.mrb[34].mxu1 %vm675_vm3, %v3068_v50  ;;  %v3952_v50 = vld [vmem:[%s5581_s17] ss:$0 sm:$0xff] }
0x16c6   :  { %4422 = vmatprep.mubr.msk.f32.mxu1 %vm4798_vm0, %v5369_v54  ;;  %4565 = vmatpush3.bf16.msra.mxu1 %v4564_v14 }
0x16c7   :  { %4566 = vmatprep.subr.bf16.mxu1 %v4797_v0 }
0x16c8   :  { %v3219_v5 = vpop.f32.mrb[36].mxu0 }
0x16c9   :  { %v3220_v52 = vadd.f32 %v3219_v5, %v3149_v42  ;;  %v4391_v53 = vpop.f32.mrb[37].mxu0  ;;  %v3649_v42 = vld [vmem:[%s5041_s4 + $0x18] sm:$0xff]  ;;  %s4803_s4 = smov 32  }
0x16ca   :  { %4568 = vmatpush3.bf16.msra.mxu1 %v4567_v18  ;;  %v4579_v43 = vpack.c.bf16 %v3649_v42, %v3648_v40  ;;  %v3644_v53 = vld [vmem:[%s5036_s27 + $0x10] sm:$0xff] }
0x16cb   :  { %v3229_v55 = vadd.f32 %v3945_v51, %v3220_v52  ;;  %4575 = vmatprep.subr.bf16.mxu1 %v4797_v0  ;;  %v4582_v51 = vpack.c.bf16 %v3643_v1, %v3642_v49 }
0x16cd   :  { %v3230_v56 = vsel %vm675_vm3, %v3229_v55, 0.0 }
0x16ce   :  { %3231 = vadd.xlane.f32.xlu1 %v3230_v56 }
0x16d0   :  { %v3422_v57 = vpop.f32.mrb[38].mxu0 }
0x16d1   :  { %v4413_v58 = vpop.f32.mrb[39].mxu0 }
0x175b   :  { %v3232_v61 = vpop.xlane.xlu1 %3231 }
0x175c   :  { %v3234_v62 = vmul.f32 0.03125, %v3232_v61 }
0x175e   :  { %v3235_v3 = vsub.f32 %v3229_v55, %v3234_v62  ;;  %v3645_v55 = vld [vmem:[%s5036_s27 + $0x18] sm:$0xff]  ;;  %s5582_s27 = sld [smem:[#allocation36_spill]] }
0x175f   :  { %v4585_v58 = vpack.c.bf16 %v3645_v55, %v3644_v53 }
0x1760   :  { %v3236_v10 = vmul.f32 %v3235_v3, %v3235_v3 }
0x1762   :  { %v3237_v11 = vsel %vm675_vm3, %v3236_v10, 0.0 }
0x1798   :  { %v3352_v63 = vpop.f32.mrb[34].mxu1 }
0x1799   :  { %v3423_v4 = vadd.f32 %v3422_v57, %v3352_v63  ;;  %v4402_v7 = vpop.f32.mrb[35].mxu1 }
0x179b   :  { %v3432_v8 = vadd.f32 %v3950_v2, %v3423_v4 }
0x179d   :  { %v3433_v9 = vsel %vm675_vm3, %v3432_v8, 0.0 }
0x179e   :  { %3434 = vadd.xlane.f32.xlu1 %v3433_v9 }
0x17a2   :  { %3238 = vadd.xlane.f32.xlu1 %v3237_v11 }
0x182b   :  { %v3435_v19 = vpop.xlane.xlu1 %3434 }
0x182c   :  { %v3436_v20 = vmul.f32 0.03125, %v3435_v19 }
0x182e   :  { %v3437_v6 = vsub.f32 %v3432_v8, %v3436_v20  ;;  %v3953_v8 = vld [vmem:[%s5582_s27] ss:$0 sm:$0xff] }
0x182f   :  { %v3239_v21 = vpop.xlane.xlu1 %3238 }
0x1830   :  { %v3240_v22 = vmul.f32 0.03125, %v3239_v21  ;;  %v3438_v23 = vmul.f32 %v3437_v6, %v3437_v6  ;;  %v3955_v21 = vld [vmem:[#allocation2] ss:$0 sm:$0xff] }
0x1832   :  { %v3241_v24 = vadd.f32 1e-05, %v3240_v22  ;;  %v3439_v25 = vsel %vm675_vm3, %v3438_v23, 0.0 }
0x1833   :  { %3440 = vadd.xlane.f32.xlu1 %v3439_v25 }
0x1834   :  { %4687 = vrsqrt.f32 %v3241_v24 }
0x183e   :  { %v4688_v17 = vpop.eup %4687 }
0x183f   :  { %v3243_v27 = vmul.f32 %v4688_v17, %v3235_v3 }
0x1841   :  { %v3250_v29 = vmul.f32 %v3946_v26, %v3243_v27 }
0x1843   :  { %v5456_v30 = vadd.f32 %v3947_v28, %v3250_v29  ;;  %v3959_v29 = vld [vmem:[#allocation4] ss:$0 sm:$0xff] }
0x1845   :  { %4423 = vmatmul.mubr.msk.f32.vlgmr.msra.gmra.mrb[36].mxu1 %vm675_vm3, %v5456_v30  ;;  %3800 = vst.msk [vmem:[%s5051_s20] sm:$0xff] %vm675_vm3, %v5456_v30  ;;  %v3258_v31 = vmul.f32 %v5456_v30, %v5456_v30 }
0x1846   :  { %4444 = vmatprep.mubr.msk.f32.mxu1 %vm4798_vm0, %v5369_v54  ;;  %4577 = vmatpush3.bf16.msra.mxu1 %v4576_v37 }
0x1847   :  { %v3259_v32 = vsel %vm675_vm3, %v3258_v31, 0.0  ;;  %4578 = vmatprep.subr.bf16.mxu1 %v4797_v0 }
0x1848   :  { %3260 = vadd.xlane.f32.xlu1 %v3259_v32 }
0x184a   :  { %4580 = vmatpush3.bf16.msra.mxu1 %v4579_v43 }
0x18c0   :  { %v3441_v44 = vpop.xlane.xlu1 %3440 }
0x18c1   :  { %v3442_v45 = vmul.f32 0.03125, %v3441_v44 }
0x18c3   :  { %v3443_v46 = vadd.f32 1e-05, %v3442_v45 }
0x18c5   :  { %4689 = vrsqrt.f32 %v3443_v46 }
0x18cf   :  { %v4690_v60 = vpop.eup %4689 }
0x18d0   :  { %v3445_v48 = vmul.f32 %v4690_v60, %v3437_v6 }
0x18d2   :  { %v3452_v5 = vmul.f32 %v3951_v47, %v3445_v48 }
0x18d4   :  { %v5483_v52 = vadd.f32 %v3952_v50, %v3452_v5 }
0x18d5   :  { %v3261_v56 = vpop.xlane.xlu1 %3260 }
0x18d6   :  { %4691 = vrsqrt.f32 %v3261_v56  ;;  %3801 = vrot.lane.b32.xlu1 %v5483_v52, %s4803_s4  ;;  %4434 = vmatmul.mubr.msk.f32.vlgmr.msra.gmra.mrb[40].mxu0 %vm675_vm3, %v5483_v52  ;;  %v3460_v57 = vmul.f32 %v5483_v52, %v5483_v52  ;;  %vm3264_vm5 = vcmp.eq.f32.partialorder %v3261_v56, inf  ;;  %v3267_v2 = vand.u32 2147483648, %v3261_v56 }
0x18d7   :  { %4445 = vmatmul.mubr.msk.f32.vlgmr.msra.gmra.mrb[38].mxu1 %vm675_vm3, %v5483_v52  ;;  %4583 = vmatpush3.bf16.msra.mxu0 %v4582_v51  ;;  %vm3266_vm6 = vcmp.eq.f32.partialorder %v3261_v56, 0.0 }
0x18d8   :  { %4584 = vmatprep.subr.bf16.mxu0 %v4797_v0  ;;  %4455 = vmatprep.mubr.msk.f32.mxu0 %vm4798_vm0, %v5369_v54  ;;  %v3461_v61 = vsel %vm675_vm3, %v3460_v57, 0.0 }
0x18d9   :  { %3462 = vadd.xlane.f32.xlu0 %v3461_v61 }
0x18db   :  { %4586 = vmatpush3.bf16.msra.mxu0 %v4585_v58 }
0x18de   :  { %4456 = vmatmul.mubr.msk.f32.vlgmr.msra.gmra.mrb[42].mxu0 %vm675_vm3, %v5456_v30 }
0x18e0   :  { %v4692_v62 = vpop.eup %4691 }
0x18e1   :  { %v3263_v63 = vmul.f32 %v4692_v62, %v3261_v56 }
0x18e3   :  { %v3265_v3 = vsel %vm3264_vm5, %v3261_v56, %v3263_v63 }
0x18e4   :  { %v3268_v0 = vsel %vm3266_vm6, %v3267_v2, %v3265_v3 }
0x18e5   :  { %v3269_v4 = vmax.f32 %v3268_v0, 1e-12 }
0x18e7   :  { %4693 = vrcp.f32 %v3269_v4 }
0x18f1   :  { %v4694_v54 = vpop.eup %4693 }
0x18f2   :  { %v3271_v7 = vmul.f32 %v4694_v54, %v5456_v30 }
0x18f4   :  { %3807 = vrot.lane.b32.xlu1 %v3271_v7, %s4804_s21 }
0x1918   :  { %v3554_v9 = vpop.f32.mrb[36].mxu1 }
0x1919   :  { %v3555_v10 = vadd.f32 %v3953_v8, %v3554_v9  ;;  %v4424_v11 = vpop.f32.mrb[37].mxu1 }
0x191b   :  { %3819 = vst.msk [vmem:[%s5051_s20 + $0x8] sm:$0xff] %vm3818_vm7, %v3555_v10 }
0x1948   :  { %v3802_v12 = vpop.permute.xlu1 %3801 }
0x1949   :  { %3805 = vst.msk [vmem:[%s5051_s20] sm:$0xff] %vm3804_vm8, %v3802_v12 }
0x1966   :  { %v3808_v13 = vpop.permute.xlu1 %3807  ;;  %v3463_v14 = vpop.xlane.xlu0 %3462 }
0x1967   :  { %3811 = vst.msk [vmem:[%s5051_s20] sm:$0xff] %vm3810_vm9, %v3808_v13  ;;  %4695 = vrsqrt.f32 %v3463_v14  ;;  %vm3466_vm10 = vcmp.eq.f32.partialorder %v3463_v14, inf  ;;  %v3469_v19 = vand.u32 2147483648, %v3463_v14  ;;  %vm3468_vm11 = vcmp.eq.f32.partialorder %v3463_v14, 0.0 }
0x1971   :  { %v4696_v15 = vpop.eup %4695 }
0x1972   :  { %v3465_v16 = vmul.f32 %v4696_v15, %v3463_v14 }
0x1974   :  { %v3467_v18 = vsel %vm3466_vm10, %v3463_v14, %v3465_v16 }
0x1975   :  { %v3470_v20 = vsel %vm3468_vm11, %v3469_v19, %v3467_v18 }
0x1976   :  { %v3471_v6 = vmax.f32 %v3470_v20, 1e-12 }
0x1978   :  { %4697 = vrcp.f32 %v3471_v6 }
0x1982   :  { %v4698_v17 = vpop.eup %4697 }
0x1983   :  { %v3473_v27 = vmul.f32 %v4698_v17, %v5483_v52 }
0x19a9   :  { %v3638_v22 = vpop.f32.mrb[40].mxu0 }
0x19aa   :  { %v3639_v23 = vadd.f32 %v3955_v21, %v3638_v22  ;;  %v3716_v24 = vpop.f32.mrb[38].mxu1  ;;  %v4435_v25 = vpop.f32.mrb[41].mxu0 }
0x19ab   :  { %v4446_v26 = vpop.f32.mrb[39].mxu1 }
0x19ac   :  { %3821 = vrot.lane.b32.xlu1 %v3639_v23, %s4805_s25 }
0x19b0   :  { %3813 = vrot.lane.b32.xlu1 %v3473_v27, %s4806_s29 }
0x19b1   :  { %v3786_v28 = vpop.f32.mrb[42].mxu0 }
0x19b2   :  { %v3787_v30 = vadd.f32 %v3786_v28, %v3716_v24  ;;  %v4457_v31 = vpop.f32.mrb[43].mxu0 }
0x19b4   :  { %v3797_v32 = vadd.f32 %v3959_v29, %v3787_v30 }
0x19b6   :  { %3827 = vrot.lane.b32.xlu0 %v3797_v32, %s4807_s3 }
0x1a1e   :  { %v3822_v59 = vpop.permute.xlu1 %3821 }
0x1a1f   :  { %3825 = vst.msk [vmem:[%s5051_s20 + $0x8] sm:$0xff] %vm3824_vm12, %v3822_v59 }
0x1a22   :  { %v3814_v33 = vpop.permute.xlu1 %3813 }
0x1a23   :  { %3817 = vst.msk [vmem:[%s5051_s20] sm:$0xff] %vm3816_vm13, %v3814_v33 }
0x1a28   :  { %v3828_v34 = vpop.permute.xlu0 %3827 }
0x1a29   :  { %3831 = vst.msk [vmem:[%s5051_s20 + $0x8] sm:$0xff] %vm3830_vm14, %v3828_v34 }
0x1a2a   :  { %3836 = vsyncpa [#allocation3], 1 }
0x1a2b   :  { %3837 = vsyncpa [#allocation5], 1 }

</bundles_post_ra>
